<compile_context>
chip_gen: v7x
topology: tpu7x:2x2x1
jax: 0.10.0
libtpu: 0.0.40
codegen_flags: <defaults>
</compile_context>

<pallas_src>
import functools

import jax
import jax.numpy as jnp
from jax.experimental import pallas as pl
from jax.experimental.pallas import tpu as pltpu

EPS = 1e-5
NEG_SLOPE = 0.2
LANES = 128


def _regressor_kernel(x_ref, w_ref, aux_ref, out_ref, xpad_ref, *, rows_per_group):
    """Fused MLP forward for `groups_per_step` independent BN groups.

    x_ref    : (rows, indim)      raw input rows for this grid step (unpadded lanes)
    w_ref    : (L+1, 128, 128)    layers 0..L-1: hidden Linear weights (zero padded);
                                  slab L: [w_theta | w_beta | 0] fused head weight
    aux_ref  : (L+1, 8, 128)      layers 0..L-1: row 0 = BN gamma, row 1 = BN beta;
                                  slab L:        row 0 = fused head bias
    out_ref  : (rows, 128)        [theta | beta | 0] lane-dense packed output
    xpad_ref : (rows, 128) VMEM   scratch used to fold the lane-pad into the kernel
    """
    rows, indim = x_ref.shape
    n_hidden = w_ref.shape[0] - 1
    gpb = rows // rows_per_group  # groups stacked on sublanes in this step

    # Fold the indim->128 lane pad into the kernel (no wrapper-side pad launch).
    # Zero lanes stay exactly zero through the whole network.
    xpad_ref[...] = jnp.zeros_like(xpad_ref)
    xpad_ref[:, :indim] = x_ref[...].astype(jnp.float32)
    h = xpad_ref[...]                                            # (rows, 128)

    for i in range(n_hidden):
        # Linear. Hidden-layer bias omitted: it cancels exactly under
        # training-mode BatchNorm (per-feature mean subtraction).
        z = jnp.dot(h, w_ref[i], preferred_element_type=jnp.float32)   # (rows, 128)

        # BatchNorm1d (training forward), statistics per group, folded to a
        # single per-feature scale/shift.
        a = aux_ref[i]                                           # (8,128): row0 gamma, row1 beta
        zg = z.reshape(gpb, rows_per_group, LANES)
        mean = jnp.mean(zg, axis=1, keepdims=True)               # (gpb, 1, 128)
        mean_sq = jnp.mean(zg * zg, axis=1, keepdims=True)
        var = jnp.maximum(mean_sq - mean * mean, 0.0)            # clamp: guard rsqrt vs f32 cancellation
        s = a[0:1, :].reshape(1, 1, LANES) * jax.lax.rsqrt(var + EPS)
        t = a[1:2, :].reshape(1, 1, LANES) - mean * s
        zn = zg * s + t

        # LeakyReLU(0.2) as a single vmax (valid since slope < 1).
        h = jnp.maximum(zn, NEG_SLOPE * zn).reshape(rows, LANES)

    # Fused theta|beta head: one MXU matmul + bias, one unmasked lane-dense store.
    head_b = aux_ref[n_hidden]
    out_ref[...] = (jnp.dot(h, w_ref[n_hidden], preferred_element_type=jnp.float32)
                    + head_b[0:1, :])


def make_params(key, indim, hidden_dim, thetadim, betadim, hidden_layer=3):
    """Deterministic synthetic parameters (PyTorch layout: W stored as (in, out))."""
    dims_in = [indim] + [hidden_dim] * hidden_layer
    params = []
    k = key
    for din in dims_in:
        k, kw, kb, kg, kbt = jax.random.split(k, 5)
        w = jax.random.normal(kw, (din, hidden_dim), jnp.float32) * 0.1
        b = jax.random.normal(kb, (1, hidden_dim), jnp.float32) * 0.1
        # exercise the BN affine path (learnable in the module)
        gamma = 1.0 + 0.1 * jax.random.normal(kg, (1, hidden_dim), jnp.float32)
        beta = 0.1 * jax.random.normal(kbt, (1, hidden_dim), jnp.float32)
        params.extend([w, b, gamma, beta])
    k, kw, kb = jax.random.split(k, 3)
    wth = jax.random.normal(kw, (hidden_dim, thetadim), jnp.float32) * 0.1
    bth = jax.random.normal(kb, (1, thetadim), jnp.float32) * 0.1
    k, kw, kb = jax.random.split(k, 3)
    wbe = jax.random.normal(kw, (hidden_dim, betadim), jnp.float32) * 0.1
    bbe = jax.random.normal(kb, (1, betadim), jnp.float32) * 0.1
    params.extend([wth, bth, wbe, bbe])
    return params


def pack_params(params, hidden_dim, thetadim, betadim):
    """Pack per-layer parameters into two padded slabs (the kernel operands)."""
    assert hidden_dim <= LANES and thetadim + betadim <= LANES
    n_layers = len(params) // 4 - 1              # hidden Linear+BN blocks (4 here)
    w_slab = jnp.zeros((n_layers + 1, LANES, LANES), jnp.float32)
    aux = jnp.zeros((n_layers + 1, 8, LANES), jnp.float32)
    aux = aux.at[:n_layers, 0, :].set(1.0)       # padded-lane gamma = 1 (harmless)
    for i in range(n_layers):
        w, _b, g, bt = params[4 * i:4 * i + 4]   # Linear bias dropped: cancels in training-mode BN
        din, dout = w.shape
        w_slab = w_slab.at[i, :din, :dout].set(w)
        aux = aux.at[i, 0, :dout].set(g[0])
        aux = aux.at[i, 1, :dout].set(bt[0])
    wth, bth, wbe, bbe = params[-4:]
    w_slab = w_slab.at[n_layers, :hidden_dim, :thetadim].set(wth)
    w_slab = w_slab.at[n_layers, :hidden_dim, thetadim:thetadim + betadim].set(wbe)
    aux = aux.at[n_layers, 0, :thetadim].set(bth[0])
    aux = aux.at[n_layers, 0, thetadim:thetadim + betadim].set(bbe[0])
    return w_slab, aux


def regressor_forward(x, w_slab, aux, *, groups_per_step=2):
    """x: (n_groups, rows_per_group, indim) -- each group is one independent BN batch.

    Returns the packed (n_groups, rows_per_group, 128) output with
    lanes [0:thetadim] = theta and [thetadim:thetadim+betadim] = beta.
    theta/beta are split at the consumer (keeps the forward to a single launch).
    """
    n_groups, rows_per_group, indim = x.shape
    assert indim <= LANES
    assert rows_per_group % 8 == 0, "group rows must be a sublane multiple (rows are never padded: BN stats)"
    assert n_groups % groups_per_step == 0

    rows_total = n_groups * rows_per_group
    block_rows = groups_per_step * rows_per_group
    x2 = x.reshape(rows_total, indim).astype(jnp.float32)

    n_slabs = w_slab.shape[0]
    flops = 2 * rows_total * LANES * LANES * n_slabs + 12 * rows_total * LANES * (n_slabs - 1)
    bytes_accessed = 4 * (x2.size + w_slab.size + aux.size + rows_total * LANES)

    kernel = functools.partial(_regressor_kernel, rows_per_group=rows_per_group)
    out = pl.pallas_call(
        kernel,
        out_shape=jax.ShapeDtypeStruct((rows_total, LANES), jnp.float32),
        grid=(n_groups // groups_per_step,),
        in_specs=[
            pl.BlockSpec((block_rows, indim), lambda g: (g, 0)),
            # Constant index maps: parameter slabs are DMA'd once and stay resident.
            pl.BlockSpec((n_slabs, LANES, LANES), lambda g: (0, 0, 0)),
            pl.BlockSpec((n_slabs, 8, LANES), lambda g: (0, 0, 0)),
        ],
        out_specs=pl.BlockSpec((block_rows, LANES), lambda g: (g, 0)),
        scratch_shapes=[pltpu.VMEM((block_rows, LANES), jnp.float32)],
        compiler_params=pltpu.CompilerParams(
            dimension_semantics=("parallel",)),   # shard grid steps across v7x's two TensorCores
        cost_estimate=pl.CostEstimate(
            flops=flops,
            transcendentals=(n_slabs - 1) * LANES * n_groups,
            bytes_accessed=bytes_accessed),
    )(x2, w_slab, aux)
    return out.reshape(n_groups, rows_per_group, LANES)


def regressor_reference(x, params):
    """Pure-JAX reference for ONE BN group (keeps hidden Linear biases, unpadded shapes)."""
    h = x.astype(jnp.float32)
    n_layers = len(params) // 4 - 1
    for i in range(n_layers):
        w, b, g, bt = params[4 * i:4 * i + 4]
        z = h @ w + b
        mean = jnp.mean(z, axis=0, keepdims=True)
        var = jnp.mean((z - mean) ** 2, axis=0, keepdims=True)
        zn = (z - mean) / jnp.sqrt(var + EPS) * g + bt
        h = jnp.where(zn > 0, zn, NEG_SLOPE * zn)
    wth, bth, wbe, bbe = params[-4:]
    return h @ wth + bth, h @ wbe + bbe


if __name__ == "__main__":
    # Small shapes consistent with the module: indim=57, hidden_dim=32 (scaled-down
    # 256), thetadim=72, betadim=10, hidden_layer=3; 4 independent BN groups of 16
    # rows each, 2 groups per grid step.
    n_groups, rows_per_group = 4, 16
    indim, hidden_dim, thetadim, betadim, hidden_layer = 57, 32, 72, 10, 3

    key = jax.random.PRNGKey(0)
    kx, kp = jax.random.split(key)
    x = jax.random.normal(kx, (n_groups, rows_per_group, indim), jnp.float32)
    params = make_params(kp, indim, hidden_dim, thetadim, betadim, hidden_layer=hidden_layer)
    w_slab, aux = pack_params(params, hidden_dim, thetadim, betadim)

    packed = regressor_forward(x, w_slab, aux, groups_per_step=2)
    packed = jax.block_until_ready(packed)

    # One contiguous slice of the packed output; split theta/beta at the consumer.
    tb = packed[..., :thetadim + betadim]
    theta, beta = tb[..., :thetadim], tb[..., thetadim:]

    # Reference: each group is an independent forward (its own BN statistics).
    theta_ref, beta_ref = [], []
    for g in range(n_groups):
        th, be = regressor_reference(x[g], params)
        theta_ref.append(th)
        beta_ref.append(be)
    theta_ref = jnp.stack(theta_ref)
    beta_ref = jnp.stack(beta_ref)

    assert theta.shape == (n_groups, rows_per_group, thetadim)
    assert beta.shape == (n_groups, rows_per_group, betadim)
    assert jnp.allclose(theta, theta_ref, atol=1e-4, rtol=1e-4)
    assert jnp.allclose(beta, beta_ref, atol=1e-4, rtol=1e-4)

    # TODO(synk): nn.Dropout path (use_dropout=True) not implemented; the module's
    # default forward (use_dropout=False) has no dropout, so nothing is faked.
    print("KERNEL_OK")
</pallas_src>

<mosaic_0001>
module attributes {stable_mosaic.version = 11 : i64} {
  func.func @_regressor_kernel(%arg0: i32, %arg1: memref<32x57xf32, #tpu.memory_space<vmem>>, %arg2: memref<5x128x128xf32, #tpu.memory_space<vmem>>, %arg3: memref<5x8x128xf32, #tpu.memory_space<vmem>>, %arg4: memref<32x128xf32, #tpu.memory_space<vmem>>, %arg5: memref<32x128xf32, #tpu.memory_space<vmem>>) attributes {dimension_semantics = [#tpu.dimension_semantics<parallel>], iteration_bounds = array<i64: 2>, scalar_prefetch = 0 : i64, scratch_operands = 1 : i64, tpu.core_type = #tpu.core_type<tc>, window_params = [{transform_indices = @transform_0, window_bounds = array<i64: 32, 57>}, {pipeline_mode = #tpu.pipeline_mode<synchronous>, transform_indices = @transform_1, window_bounds = array<i64: 5, 128, 128>}, {pipeline_mode = #tpu.pipeline_mode<synchronous>, transform_indices = @transform_2, window_bounds = array<i64: 5, 8, 128>}, {transform_indices = @transform_3, window_bounds = array<i64: 32, 128>}]} {
    %cst = arith.constant 0.000000e+00 : f32
    %0 = vector.broadcast %cst : f32 to vector<32x128xf32>
    %c0 = arith.constant 0 : index
    %c0_0 = arith.constant 0 : index
    %1 = vector.load %arg5[%c0, %c0_0] : memref<32x128xf32, #tpu.memory_space<vmem>>, vector<32x128xf32>
    tpu.vector_store %arg5[%c0, %c0_0], %0 {strides = array<i32>} : memref<32x128xf32, #tpu.memory_space<vmem>>, vector<32x128xf32>,
    %c0_1 = arith.constant 0 : index
    %c0_2 = arith.constant 0 : index
    %2 = vector.load %arg1[%c0_1, %c0_2] : memref<32x57xf32, #tpu.memory_space<vmem>>, vector<32x57xf32>
    %c0_3 = arith.constant 0 : index
    %c0_4 = arith.constant 0 : index
    %3 = vector.load %arg5[%c0_3, %c0_4] : memref<32x128xf32, #tpu.memory_space<vmem>>, vector<32x57xf32>
    tpu.vector_store %arg5[%c0_3, %c0_4], %2 {strides = array<i32>} : memref<32x128xf32, #tpu.memory_space<vmem>>, vector<32x57xf32>,
    %c0_5 = arith.constant 0 : index
    %c0_6 = arith.constant 0 : index
    %4 = vector.load %arg5[%c0_5, %c0_6] : memref<32x128xf32, #tpu.memory_space<vmem>>, vector<32x128xf32>
    %c0_7 = arith.constant 0 : index
    %c0_8 = arith.constant 0 : index
    %c0_9 = arith.constant 0 : index
    %5 = vector.load %arg2[%c0_7, %c0_8, %c0_9] : memref<5x128x128xf32, #tpu.memory_space<vmem>>, vector<1x128x128xf32>
    %6 = vector.shape_cast %5 : vector<1x128x128xf32> to vector<128x128xf32>
    %cst_10 = arith.constant dense<0.000000e+00> : vector<32x128xf32>
    %7 = tpu.matmul %4, %6, %cst_10 {dimension_numbers = #tpu.dot_dimension_numbers<[1], [0], [0], [1], [0, 0, 1, 1], [], []>} : vector<32x128xf32>, vector<128x128xf32>, vector<32x128xf32> -> vector<32x128xf32>
    %c0_11 = arith.constant 0 : index
    %c0_12 = arith.constant 0 : index
    %c0_13 = arith.constant 0 : index
    %8 = vector.load %arg3[%c0_11, %c0_12, %c0_13] : memref<5x8x128xf32, #tpu.memory_space<vmem>>, vector<1x8x128xf32>
    %9 = vector.shape_cast %8 : vector<1x8x128xf32> to vector<8x128xf32>
    %10 = vector.shape_cast %7 : vector<32x128xf32> to vector<2x16x128xf32>
    %cst_14 = arith.constant dense<0.000000e+00> : vector<2x128xf32>
    %11 = vector.multi_reduction <add>, %10, %cst_14 [1] : vector<2x16x128xf32> to vector<2x128xf32>
    %12 = vector.shape_cast %11 : vector<2x128xf32> to vector<2x1x128xf32>
    %cst_15 = arith.constant 1.600000e+01 : f32
    %13 = vector.broadcast %cst_15 : f32 to vector<2x1x128xf32>
    %14 = arith.divf %12, %13 : vector<2x1x128xf32>
    %15 = arith.mulf %10, %10 : vector<2x16x128xf32>
    %cst_16 = arith.constant dense<0.000000e+00> : vector<2x128xf32>
    %16 = vector.multi_reduction <add>, %15, %cst_16 [1] : vector<2x16x128xf32> to vector<2x128xf32>
    %17 = vector.shape_cast %16 : vector<2x128xf32> to vector<2x1x128xf32>
    %cst_17 = arith.constant 1.600000e+01 : f32
    %18 = vector.broadcast %cst_17 : f32 to vector<2x1x128xf32>
    %19 = arith.divf %17, %18 : vector<2x1x128xf32>
    %20 = arith.mulf %14, %14 : vector<2x1x128xf32>
    %21 = arith.subf %19, %20 : vector<2x1x128xf32>
    %cst_18 = arith.constant 0.000000e+00 : f32
    %22 = vector.broadcast %cst_18 : f32 to vector<2x1x128xf32>
    %23 = arith.maximumf %21, %22 : vector<2x1x128xf32>
    %24 = vector.extract_strided_slice %9 {offsets = [0, 0], sizes = [1, 128], strides = [1, 1]} : vector<8x128xf32> to vector<1x128xf32>
    %25 = vector.shape_cast %24 : vector<1x128xf32> to vector<1x1x128xf32>
    %cst_19 = arith.constant 9.99999974E-6 : f32
    %26 = vector.broadcast %cst_19 : f32 to vector<2x1x128xf32>
    %27 = arith.addf %23, %26 : vector<2x1x128xf32>
    %28 = math.rsqrt %27 : vector<2x1x128xf32>
    %29 = vector.broadcast %25 : vector<1x1x128xf32> to vector<2x1x128xf32>
    %30 = arith.mulf %29, %28 : vector<2x1x128xf32>
    %31 = vector.extract_strided_slice %9 {offsets = [1, 0], sizes = [1, 128], strides = [1, 1]} : vector<8x128xf32> to vector<1x128xf32>
    %32 = vector.shape_cast %31 : vector<1x128xf32> to vector<1x1x128xf32>
    %33 = arith.mulf %14, %30 : vector<2x1x128xf32>
    %34 = vector.broadcast %32 : vector<1x1x128xf32> to vector<2x1x128xf32>
    %35 = arith.subf %34, %33 : vector<2x1x128xf32>
    %36 = vector.broadcast %30 : vector<2x1x128xf32> to vector<2x16x128xf32>
    %37 = arith.mulf %10, %36 : vector<2x16x128xf32>
    %38 = vector.broadcast %35 : vector<2x1x128xf32> to vector<2x16x128xf32>
    %39 = arith.addf %37, %38 : vector<2x16x128xf32>
    %cst_20 = arith.constant 2.000000e-01 : f32
    %40 = vector.broadcast %cst_20 : f32 to vector<2x16x128xf32>
    %41 = arith.mulf %40, %39 : vector<2x16x128xf32>
    %42 = arith.maximumf %39, %41 : vector<2x16x128xf32>
    %43 = vector.shape_cast %42 : vector<2x16x128xf32> to vector<32x128xf32>
    %c1 = arith.constant 1 : index
    %c0_21 = arith.constant 0 : index
    %c0_22 = arith.constant 0 : index
    %44 = vector.load %arg2[%c1, %c0_21, %c0_22] : memref<5x128x128xf32, #tpu.memory_space<vmem>>, vector<1x128x128xf32>
    %45 = vector.shape_cast %44 : vector<1x128x128xf32> to vector<128x128xf32>
    %cst_23 = arith.constant dense<0.000000e+00> : vector<32x128xf32>
    %46 = tpu.matmul %43, %45, %cst_23 {dimension_numbers = #tpu.dot_dimension_numbers<[1], [0], [0], [1], [0, 0, 1, 1], [], []>} : vector<32x128xf32>, vector<128x128xf32>, vector<32x128xf32> -> vector<32x128xf32>
    %c1_24 = arith.constant 1 : index
    %c0_25 = arith.constant 0 : index
    %c0_26 = arith.constant 0 : index
    %47 = vector.load %arg3[%c1_24, %c0_25, %c0_26] : memref<5x8x128xf32, #tpu.memory_space<vmem>>, vector<1x8x128xf32>
    %48 = vector.shape_cast %47 : vector<1x8x128xf32> to vector<8x128xf32>
    %49 = vector.shape_cast %46 : vector<32x128xf32> to vector<2x16x128xf32>
    %cst_27 = arith.constant dense<0.000000e+00> : vector<2x128xf32>
    %50 = vector.multi_reduction <add>, %49, %cst_27 [1] : vector<2x16x128xf32> to vector<2x128xf32>
    %51 = vector.shape_cast %50 : vector<2x128xf32> to vector<2x1x128xf32>
    %cst_28 = arith.constant 1.600000e+01 : f32
    %52 = vector.broadcast %cst_28 : f32 to vector<2x1x128xf32>
    %53 = arith.divf %51, %52 : vector<2x1x128xf32>
    %54 = arith.mulf %49, %49 : vector<2x16x128xf32>
    %cst_29 = arith.constant dense<0.000000e+00> : vector<2x128xf32>
    %55 = vector.multi_reduction <add>, %54, %cst_29 [1] : vector<2x16x128xf32> to vector<2x128xf32>
    %56 = vector.shape_cast %55 : vector<2x128xf32> to vector<2x1x128xf32>
    %cst_30 = arith.constant 1.600000e+01 : f32
    %57 = vector.broadcast %cst_30 : f32 to vector<2x1x128xf32>
    %58 = arith.divf %56, %57 : vector<2x1x128xf32>
    %59 = arith.mulf %53, %53 : vector<2x1x128xf32>
    %60 = arith.subf %58, %59 : vector<2x1x128xf32>
    %cst_31 = arith.constant 0.000000e+00 : f32
    %61 = vector.broadcast %cst_31 : f32 to vector<2x1x128xf32>
    %62 = arith.maximumf %60, %61 : vector<2x1x128xf32>
    %63 = vector.extract_strided_slice %48 {offsets = [0, 0], sizes = [1, 128], strides = [1, 1]} : vector<8x128xf32> to vector<1x128xf32>
    %64 = vector.shape_cast %63 : vector<1x128xf32> to vector<1x1x128xf32>
    %cst_32 = arith.constant 9.99999974E-6 : f32
    %65 = vector.broadcast %cst_32 : f32 to vector<2x1x128xf32>
    %66 = arith.addf %62, %65 : vector<2x1x128xf32>
    %67 = math.rsqrt %66 : vector<2x1x128xf32>
    %68 = vector.broadcast %64 : vector<1x1x128xf32> to vector<2x1x128xf32>
    %69 = arith.mulf %68, %67 : vector<2x1x128xf32>
    %70 = vector.extract_strided_slice %48 {offsets = [1, 0], sizes = [1, 128], strides = [1, 1]} : vector<8x128xf32> to vector<1x128xf32>
    %71 = vector.shape_cast %70 : vector<1x128xf32> to vector<1x1x128xf32>
    %72 = arith.mulf %53, %69 : vector<2x1x128xf32>
    %73 = vector.broadcast %71 : vector<1x1x128xf32> to vector<2x1x128xf32>
    %74 = arith.subf %73, %72 : vector<2x1x128xf32>
    %75 = vector.broadcast %69 : vector<2x1x128xf32> to vector<2x16x128xf32>
    %76 = arith.mulf %49, %75 : vector<2x16x128xf32>
    %77 = vector.broadcast %74 : vector<2x1x128xf32> to vector<2x16x128xf32>
    %78 = arith.addf %76, %77 : vector<2x16x128xf32>
    %cst_33 = arith.constant 2.000000e-01 : f32
    %79 = vector.broadcast %cst_33 : f32 to vector<2x16x128xf32>
    %80 = arith.mulf %79, %78 : vector<2x16x128xf32>
    %81 = arith.maximumf %78, %80 : vector<2x16x128xf32>
    %82 = vector.shape_cast %81 : vector<2x16x128xf32> to vector<32x128xf32>
    %c2 = arith.constant 2 : index
    %c0_34 = arith.constant 0 : index
    %c0_35 = arith.constant 0 : index
    %83 = vector.load %arg2[%c2, %c0_34, %c0_35] : memref<5x128x128xf32, #tpu.memory_space<vmem>>, vector<1x128x128xf32>
    %84 = vector.shape_cast %83 : vector<1x128x128xf32> to vector<128x128xf32>
    %cst_36 = arith.constant dense<0.000000e+00> : vector<32x128xf32>
    %85 = tpu.matmul %82, %84, %cst_36 {dimension_numbers = #tpu.dot_dimension_numbers<[1], [0], [0], [1], [0, 0, 1, 1], [], []>} : vector<32x128xf32>, vector<128x128xf32>, vector<32x128xf32> -> vector<32x128xf32>
    %c2_37 = arith.constant 2 : index
    %c0_38 = arith.constant 0 : index
    %c0_39 = arith.constant 0 : index
    %86 = vector.load %arg3[%c2_37, %c0_38, %c0_39] : memref<5x8x128xf32, #tpu.memory_space<vmem>>, vector<1x8x128xf32>
    %87 = vector.shape_cast %86 : vector<1x8x128xf32> to vector<8x128xf32>
    %88 = vector.shape_cast %85 : vector<32x128xf32> to vector<2x16x128xf32>
    %cst_40 = arith.constant dense<0.000000e+00> : vector<2x128xf32>
    %89 = vector.multi_reduction <add>, %88, %cst_40 [1] : vector<2x16x128xf32> to vector<2x128xf32>
    %90 = vector.shape_cast %89 : vector<2x128xf32> to vector<2x1x128xf32>
    %cst_41 = arith.constant 1.600000e+01 : f32
    %91 = vector.broadcast %cst_41 : f32 to vector<2x1x128xf32>
    %92 = arith.divf %90, %91 : vector<2x1x128xf32>
    %93 = arith.mulf %88, %88 : vector<2x16x128xf32>
    %cst_42 = arith.constant dense<0.000000e+00> : vector<2x128xf32>
    %94 = vector.multi_reduction <add>, %93, %cst_42 [1] : vector<2x16x128xf32> to vector<2x128xf32>
    %95 = vector.shape_cast %94 : vector<2x128xf32> to vector<2x1x128xf32>
    %cst_43 = arith.constant 1.600000e+01 : f32
    %96 = vector.broadcast %cst_43 : f32 to vector<2x1x128xf32>
    %97 = arith.divf %95, %96 : vector<2x1x128xf32>
    %98 = arith.mulf %92, %92 : vector<2x1x128xf32>
    %99 = arith.subf %97, %98 : vector<2x1x128xf32>
    %cst_44 = arith.constant 0.000000e+00 : f32
    %100 = vector.broadcast %cst_44 : f32 to vector<2x1x128xf32>
    %101 = arith.maximumf %99, %100 : vector<2x1x128xf32>
    %102 = vector.extract_strided_slice %87 {offsets = [0, 0], sizes = [1, 128], strides = [1, 1]} : vector<8x128xf32> to vector<1x128xf32>
    %103 = vector.shape_cast %102 : vector<1x128xf32> to vector<1x1x128xf32>
    %cst_45 = arith.constant 9.99999974E-6 : f32
    %104 = vector.broadcast %cst_45 : f32 to vector<2x1x128xf32>
    %105 = arith.addf %101, %104 : vector<2x1x128xf32>
    %106 = math.rsqrt %105 : vector<2x1x128xf32>
    %107 = vector.broadcast %103 : vector<1x1x128xf32> to vector<2x1x128xf32>
    %108 = arith.mulf %107, %106 : vector<2x1x128xf32>
    %109 = vector.extract_strided_slice %87 {offsets = [1, 0], sizes = [1, 128], strides = [1, 1]} : vector<8x128xf32> to vector<1x128xf32>
    %110 = vector.shape_cast %109 : vector<1x128xf32> to vector<1x1x128xf32>
    %111 = arith.mulf %92, %108 : vector<2x1x128xf32>
    %112 = vector.broadcast %110 : vector<1x1x128xf32> to vector<2x1x128xf32>
    %113 = arith.subf %112, %111 : vector<2x1x128xf32>
    %114 = vector.broadcast %108 : vector<2x1x128xf32> to vector<2x16x128xf32>
    %115 = arith.mulf %88, %114 : vector<2x16x128xf32>
    %116 = vector.broadcast %113 : vector<2x1x128xf32> to vector<2x16x128xf32>
    %117 = arith.addf %115, %116 : vector<2x16x128xf32>
    %cst_46 = arith.constant 2.000000e-01 : f32
    %118 = vector.broadcast %cst_46 : f32 to vector<2x16x128xf32>
    %119 = arith.mulf %118, %117 : vector<2x16x128xf32>
    %120 = arith.maximumf %117, %119 : vector<2x16x128xf32>
    %121 = vector.shape_cast %120 : vector<2x16x128xf32> to vector<32x128xf32>
    %c3 = arith.constant 3 : index
    %c0_47 = arith.constant 0 : index
    %c0_48 = arith.constant 0 : index
    %122 = vector.load %arg2[%c3, %c0_47, %c0_48] : memref<5x128x128xf32, #tpu.memory_space<vmem>>, vector<1x128x128xf32>
    %123 = vector.shape_cast %122 : vector<1x128x128xf32> to vector<128x128xf32>
    %cst_49 = arith.constant dense<0.000000e+00> : vector<32x128xf32>
    %124 = tpu.matmul %121, %123, %cst_49 {dimension_numbers = #tpu.dot_dimension_numbers<[1], [0], [0], [1], [0, 0, 1, 1], [], []>} : vector<32x128xf32>, vector<128x128xf32>, vector<32x128xf32> -> vector<32x128xf32>
    %c3_50 = arith.constant 3 : index
    %c0_51 = arith.constant 0 : index
    %c0_52 = arith.constant 0 : index
    %125 = vector.load %arg3[%c3_50, %c0_51, %c0_52] : memref<5x8x128xf32, #tpu.memory_space<vmem>>, vector<1x8x128xf32>
    %126 = vector.shape_cast %125 : vector<1x8x128xf32> to vector<8x128xf32>
    %127 = vector.shape_cast %124 : vector<32x128xf32> to vector<2x16x128xf32>
    %cst_53 = arith.constant dense<0.000000e+00> : vector<2x128xf32>
    %128 = vector.multi_reduction <add>, %127, %cst_53 [1] : vector<2x16x128xf32> to vector<2x128xf32>
    %129 = vector.shape_cast %128 : vector<2x128xf32> to vector<2x1x128xf32>
    %cst_54 = arith.constant 1.600000e+01 : f32
    %130 = vector.broadcast %cst_54 : f32 to vector<2x1x128xf32>
    %131 = arith.divf %129, %130 : vector<2x1x128xf32>
    %132 = arith.mulf %127, %127 : vector<2x16x128xf32>
    %cst_55 = arith.constant dense<0.000000e+00> : vector<2x128xf32>
    %133 = vector.multi_reduction <add>, %132, %cst_55 [1] : vector<2x16x128xf32> to vector<2x128xf32>
    %134 = vector.shape_cast %133 : vector<2x128xf32> to vector<2x1x128xf32>
    %cst_56 = arith.constant 1.600000e+01 : f32
    %135 = vector.broadcast %cst_56 : f32 to vector<2x1x128xf32>
    %136 = arith.divf %134, %135 : vector<2x1x128xf32>
    %137 = arith.mulf %131, %131 : vector<2x1x128xf32>
    %138 = arith.subf %136, %137 : vector<2x1x128xf32>
    %cst_57 = arith.constant 0.000000e+00 : f32
    %139 = vector.broadcast %cst_57 : f32 to vector<2x1x128xf32>
    %140 = arith.maximumf %138, %139 : vector<2x1x128xf32>
    %141 = vector.extract_strided_slice %126 {offsets = [0, 0], sizes = [1, 128], strides = [1, 1]} : vector<8x128xf32> to vector<1x128xf32>
    %142 = vector.shape_cast %141 : vector<1x128xf32> to vector<1x1x128xf32>
    %cst_58 = arith.constant 9.99999974E-6 : f32
    %143 = vector.broadcast %cst_58 : f32 to vector<2x1x128xf32>
    %144 = arith.addf %140, %143 : vector<2x1x128xf32>
    %145 = math.rsqrt %144 : vector<2x1x128xf32>
    %146 = vector.broadcast %142 : vector<1x1x128xf32> to vector<2x1x128xf32>
    %147 = arith.mulf %146, %145 : vector<2x1x128xf32>
    %148 = vector.extract_strided_slice %126 {offsets = [1, 0], sizes = [1, 128], strides = [1, 1]} : vector<8x128xf32> to vector<1x128xf32>
    %149 = vector.shape_cast %148 : vector<1x128xf32> to vector<1x1x128xf32>
    %150 = arith.mulf %131, %147 : vector<2x1x128xf32>
    %151 = vector.broadcast %149 : vector<1x1x128xf32> to vector<2x1x128xf32>
    %152 = arith.subf %151, %150 : vector<2x1x128xf32>
    %153 = vector.broadcast %147 : vector<2x1x128xf32> to vector<2x16x128xf32>
    %154 = arith.mulf %127, %153 : vector<2x16x128xf32>
    %155 = vector.broadcast %152 : vector<2x1x128xf32> to vector<2x16x128xf32>
    %156 = arith.addf %154, %155 : vector<2x16x128xf32>
    %cst_59 = arith.constant 2.000000e-01 : f32
    %157 = vector.broadcast %cst_59 : f32 to vector<2x16x128xf32>
    %158 = arith.mulf %157, %156 : vector<2x16x128xf32>
    %159 = arith.maximumf %156, %158 : vector<2x16x128xf32>
    %160 = vector.shape_cast %159 : vector<2x16x128xf32> to vector<32x128xf32>
    %c4 = arith.constant 4 : index
    %c0_60 = arith.constant 0 : index
    %c0_61 = arith.constant 0 : index
    %161 = vector.load %arg3[%c4, %c0_60, %c0_61] : memref<5x8x128xf32, #tpu.memory_space<vmem>>, vector<1x8x128xf32>
    %162 = vector.shape_cast %161 : vector<1x8x128xf32> to vector<8x128xf32>
    %c4_62 = arith.constant 4 : index
    %c0_63 = arith.constant 0 : index
    %c0_64 = arith.constant 0 : index
    %163 = vector.load %arg2[%c4_62, %c0_63, %c0_64] : memref<5x128x128xf32, #tpu.memory_space<vmem>>, vector<1x128x128xf32>
    %164 = vector.shape_cast %163 : vector<1x128x128xf32> to vector<128x128xf32>
    %cst_65 = arith.constant dense<0.000000e+00> : vector<32x128xf32>
    %165 = tpu.matmul %160, %164, %cst_65 {dimension_numbers = #tpu.dot_dimension_numbers<[1], [0], [0], [1], [0, 0, 1, 1], [], []>} : vector<32x128xf32>, vector<128x128xf32>, vector<32x128xf32> -> vector<32x128xf32>
    %166 = vector.extract_strided_slice %162 {offsets = [0, 0], sizes = [1, 128], strides = [1, 1]} : vector<8x128xf32> to vector<1x128xf32>
    %167 = vector.broadcast %166 : vector<1x128xf32> to vector<32x128xf32>
    %168 = arith.addf %165, %167 : vector<32x128xf32>
    %c0_66 = arith.constant 0 : index
    %c0_67 = arith.constant 0 : index
    %169 = vector.load %arg4[%c0_66, %c0_67] : memref<32x128xf32, #tpu.memory_space<vmem>>, vector<32x128xf32>
    tpu.vector_store %arg4[%c0_66, %c0_67], %168 {strides = array<i32>} : memref<32x128xf32, #tpu.memory_space<vmem>>, vector<32x128xf32>,
    return
  }
  func.func @transform_0(%arg0: i32) -> (i32, i32) {
    %c0_i32 = arith.constant 0 : i32
    %c0_i32_0 = arith.constant 0 : i32
    return %arg0, %c0_i32 : i32, i32
  }
  func.func @transform_1(%arg0: i32) -> (i32, i32, i32) {
    %c0_i32 = arith.constant 0 : i32
    %c0_i32_0 = arith.constant 0 : i32
    %c0_i32_1 = arith.constant 0 : i32
    %c0_i32_2 = arith.constant 0 : i32
    return %c0_i32, %c0_i32_0, %c0_i32_1 : i32, i32, i32
  }
  func.func @transform_2(%arg0: i32) -> (i32, i32, i32) {
    %c0_i32 = arith.constant 0 : i32
    %c0_i32_0 = arith.constant 0 : i32
    %c0_i32_1 = arith.constant 0 : i32
    %c0_i32_2 = arith.constant 0 : i32
    return %c0_i32, %c0_i32_0, %c0_i32_1 : i32, i32, i32
  }
  func.func @transform_3(%arg0: i32) -> (i32, i32) {
    %c0_i32 = arith.constant 0 : i32
    %c0_i32_0 = arith.constant 0 : i32
    return %arg0, %c0_i32 : i32, i32
  }
}

</mosaic_0001>

<bundles_post_ra>
// kernel: tpu_custom_call.1
= control target key start
LH: loop header
LB: loop body
LE: loop exit
PB: predicated region body
PF: predicated region fallthrough
CT: control target
= control target key end

     0   :  { %8 = vsyncpa [#allocation4], 0  ;;  %s2259_s0 = inlined_call_operand.hbm [shape: f32[64,57], index: 0, kind: input, shape index: {}]   ;;  %s2260_s1 = inlined_call_operand.hbm [shape: f32[5,128,128], index: 1, kind: input, shape index: {}]   ;;  %s2261_s2 = inlined_call_operand.hbm [shape: f32[5,8,128], index: 2, kind: input, shape index: {}]   ;;  %s2262_s3 = inlined_call_operand.hbm [shape: f32[64,128], index: 3, kind: output, shape index: {}]  }
   0x1   :  { %10 = vsyncpa [#allocation4 + $0x1], 0 }
   0x2   :  { %11 = vsyncpa [#allocation7], 0 }
   0x3   :  { %12 = vsyncpa [#allocation5], 0 }
   0x4   :  { %14 = vsyncpa [#allocation5 + $0x1], 0  ;;  %s1991_s12 = smov 0   ;;  %s1993_s13 = smov 0  }
   0x5   :  { %s1995_s14 = smov 0   ;;  %s1997_s15 = smov 0  }
   0x6 LB: > { %s2012_s16 = sadd.s32 4294967295, %s1960_s15   ;;  %s1230_s17 = sadd.s32 4294967294, %s1960_s15   ;;  %s1960_s15 = sphi %s1997_s15, %s2282_s15   ;;  %s1956_s14 = sphi %s1995_s14, %s2281_s14   ;;  %s1952_s13 = sphi %s1993_s13, %s2280_s13   ;;  %s1948_s12 = sphi %s1991_s12, %s2279_s12  }
   0x7   : > { %p40_p0 = scmp.ne.s32.totalorder %s1952_s13, %s1948_s12  ;;  %p2263_p1 = scmp.eq.s32.totalorder %s2012_s16, 0 }
   0x8   : > { %p112_p3 = scmp.eq.s32.totalorder %s1230_s17, 1  ;;  %p1231_p5 = scmp.ge.s32.totalorder %s1960_s15, 1 }
   0x9   : > { %p2021_p4 = por %p2263_p1, %p40_p0  ;;  %p119_p7 = scmp.lt.s32.totalorder %s1960_s15, 3 }
   0xa   : > { %p2026_p6 = por %p112_p3, %p40_p0  ;;  %s1962_s21 = smov [#allocation6]  }
   0xb   : > { %s2266_s18 = scalar_select %p2021_p4, 1, 0 }
   0xc   : > { %s2267_s19 = scalar_select %p2026_p6, 1, 0 }
   0xd   : > { %p2031_p8 = pnand %p1231_p5, %p119_p7  ;;  %s131_s22 = sshll.u32 %s1962_s21, 4  ;;  %s2035_s22 = int_to_ptr.vmem [resolvable:$true] %s131_s22 }
   0xe   : > { %s1963_s24 = smov [#allocation8]   ;;  %s1804_s28 = scalar_lea.hbm %s2260_s1, 10240 }
   0xf   : > { %p1728_p9 = pneg %p2031_p8  ;;  %s144_s25 = sshll.u32 %s1963_s24, 4  ;;  %s2046_s25 = int_to_ptr.vmem [resolvable:$true] %s144_s25 }
  0x10   : > { %p1805_p12 = scmp.ne.s32.totalorder %s2260_s1, %s1804_s28  ;;  %p1811_p5 = scmp.lt.u32.totalorder %s1804_s28, %s2260_s1 }
  0x11   : > { %p2042_p11 = pnand %p1728_p9, %p2263_p1 }
  0x13   : > { %p1806_p13 = pneg %p2042_p11 }
  0x15   : > { %p1807_p0 = pnand %p1806_p13, %p1805_p12 }
  0x17   : > { %p1808_p3 = pneg %p1807_p0 }
  0x19   : > { %p1813_p7 = pnand %p1811_p5, %p1808_p3 }
  0x1b   : > { %1816 = shalt.err (!%p1813_p7)
}
  0x1c   : > { %s1817_s6 = scalar_lea.vmem %s2035_s22, 10240  ;;  %p1825_p2 = scmp.lt.s32.totalorder %s2035_s22, %s2035_s22 }
  0x1d   : > { %p1818_p9 = scmp.ne.s32.totalorder %s2035_s22, %s1817_s6  ;;  %p1826_p12 = scmp.lt.s32.totalorder %s1817_s6, %s1817_s6 }
  0x1f   : > { %p1820_p10 = pnand %p1818_p9, %p1806_p13  ;;  %p1827_p0 = por %p1826_p12, %p1825_p2 }
  0x21   : > { %p1821_p1 = pneg %p1820_p10 }
  0x23   : > { %p1828_p6 = pnand %p1827_p0, %p1821_p1 }
  0x25   : > { %1831 = shalt.err (!%p1828_p6)
}
  0x26   : > { %s1964_s7 = smov 128   ;;  %s1965_s8 = smov 8  }
  0x27   : > { %1731 = dma.hbm_to_vmem [thread:$0]  (!%p2042_p11), %s2260_s1, 10240, %s2035_s22, [#allocation7], %s1964_s7, %s1964_s7, %s1965_s8  }
  0x28   : > { %s1832_s21 = scalar_lea.hbm %s2261_s2, 640 }
  0x29   : > { %p1833_p1 = scmp.ne.s32.totalorder %s2261_s2, %s1832_s21  ;;  %p1839_p10 = scmp.lt.u32.totalorder %s1832_s21, %s2261_s2 }
  0x2b   : > { %p1835_p2 = pnand %p1833_p1, %p1806_p13 }
  0x2d   : > { %p1836_p6 = pneg %p1835_p2 }
  0x2f   : > { %p1841_p3 = pnand %p1839_p10, %p1836_p6 }
  0x31   : > { %1844 = shalt.err (!%p1841_p3)
}
  0x32   : > { %s1845_s22 = scalar_lea.vmem %s2046_s25, 640  ;;  %p1853_p12 = scmp.lt.s32.totalorder %s2046_s25, %s2046_s25 }
  0x33   : > { %p1846_p5 = scmp.ne.s32.totalorder %s2046_s25, %s1845_s22  ;;  %p1854_p0 = scmp.lt.s32.totalorder %s1845_s22, %s1845_s22 }
  0x35   : > { %p1848_p7 = pnand %p1846_p5, %p1806_p13  ;;  %p1855_p1 = por %p1854_p0, %p1853_p12 }
  0x37   : > { %p1849_p9 = pneg %p1848_p7 }
  0x39   : > { %p1856_p2 = pnand %p1855_p1, %p1849_p9 }
  0x3b   : > { %1859 = shalt.err (!%p1856_p2)
}
  0x3c   : > { %1734 = dma.hbm_to_vmem [thread:$0]  (!%p2042_p11), %s2261_s2, 640, %s2046_s25, [#allocation7], %s1964_s7, %s1964_s7, %s1965_s8  }
  0x3d   : > { %s2107_s23 = sadd.s32 1, %s1960_s15   ;;  %s27_s4 = sadd.s32 1, %s1956_s14 }
  0x3e   : > { %s24_s5 = ssub.s32 %s1960_s15, %s2107_s23  ;;  %p34_p13 = scmp.ne.s32.totalorder %s1956_s14, %s1952_s13 }
  0x3f   : > { %p25_p6 = scmp.eq.s32.totalorder %s24_s5, 0  ;;  %p35_p10 = scmp.eq.s32.totalorder %s1960_s15, 0 }
  0x40   : > { %p2270_p3 = scmp.eq.s32.totalorder %s2012_s16, 1  ;;  %p1745_p7 = scmp.lt.s32.totalorder %s1960_s15, 2 }
  0x41   : > { %s2123_s9 = scalar_select %p25_p6, %s1956_s14, %s27_s4  }
  0x42   : > { %p2117_p5 = por %p2270_p3, %p34_p13  ;;  %p36_p9 = por %p35_p10, %p34_p13 }
  0x43   : > { %s158_s10 = sand.u32 1, %s1956_s14   ;;  %s1248_s25 = sshll.u32 %s1960_s15, 9 }
  0x44   : > { %s2271_s6 = scalar_select %p2117_p5, 1, 0 }
  0x45   : > { %s1235_s11 = sshll.u32 %s158_s10, 5  ;;  %s2130_s24 = scalar_lea.hbm %s2259_s0, %s1248_s25 }
  0x46   : > { %s162_s26 = scalar_lea.vmem [#allocation3], %s1235_s11  ;;  %p2134_p11 = pnand %p1745_p7, %p36_p9 }
  0x47   : > { %s169_s27 = sshll.u32 %s162_s26, 4  ;;  %s2138_s22 = scalar_lea.sflag [#allocation4], %s158_s10  ;;  %s2132_s27 = int_to_ptr.vmem [resolvable:$true] %s169_s27 }
  0x48   : > { %s1860_s29 = scalar_lea.hbm %s2130_s24, 512  ;;  %p1862_p0 = pneg %p2134_p11 }
  0x49   : > { %p1861_p12 = scmp.ne.s32.totalorder %s2130_s24, %s1860_s29  ;;  %s1865_s5 = scalar_lea.hbm %s2259_s0, 1024 }
  0x4a   : > { %p1866_p13 = scmp.lt.u32.totalorder %s2130_s24, %s2259_s0  ;;  %p1867_p6 = scmp.lt.u32.totalorder %s1865_s5, %s1860_s29 }
  0x4b   : > { %p1863_p1 = pnand %p1862_p0, %p1861_p12  ;;  %p1869_p3 = scmp.lt.u32.totalorder %s1860_s29, %s2130_s24 }
  0x4c   : > { %p1868_p10 = por %p1867_p6, %p1866_p13 }
  0x4d   : > { %p1864_p2 = pneg %p1863_p1 }
  0x4e   : > { %p1870_p7 = por %p1869_p3, %p1868_p10 }
  0x50   : > { %p1871_p9 = pnand %p1870_p7, %p1864_p2 }
  0x52   : > { %1874 = shalt.err (!%p1871_p9)
}
  0x53   : > { %s1875_s10 = scalar_lea.vmem %s2132_s27, 512  ;;  %s1966_s17 = smov [#allocation3]  }
  0x54   : > { %p1876_p12 = scmp.ne.s32.totalorder %s2132_s27, %s1875_s10  ;;  %s1880_s21 = sshll.u32 %s1966_s17, 4  ;;  %s1881_s21 = int_to_ptr.vmem [resolvable:$false] %s1880_s21 }
  0x55   : > { %s1882_s26 = scalar_lea.vmem %s1881_s21, 1024  ;;  %p1883_p4 = scmp.lt.s32.totalorder %s2132_s27, %s1881_s21 }
  0x56   : > { %p1878_p1 = pnand %p1876_p12, %p1862_p0  ;;  %p1884_p13 = scmp.lt.s32.totalorder %s1882_s26, %s1875_s10 }
  0x58   : > { %p1879_p5 = pneg %p1878_p1  ;;  %p1885_p6 = por %p1884_p13, %p1883_p4 }
  0x5a   : > { %p1886_p10 = pnand %p1885_p6, %p1879_p5 }
  0x5c   : > { %1889 = shalt.err (!%p1886_p10)
}
  0x5d   : > { %1738 = dma.hbm_to_vmem [thread:$0]  (!%p2134_p11), %s2130_s24, 512, %s2132_s27, %s2138_s22, %s1964_s7, %s1964_s7, %s1965_s8  }
  0x5e   : > { %181 = sbr.rel (%p2031_p8) target bundleno = 1434 (0x59a), region = 32  ;;  %s2172_s29 = sand.u32 (!%p2031_p8), 1, %s1952_s13  }
  0x5f   : > { %s1239_s30 = sshll.u32 (!%p2031_p8), %s2172_s29, 5  ;;  %s184_s4 = scalar_lea.sflag (!%p2031_p8), [#allocation4], %s2172_s29 }
  0x60   : > { %s187_s28 = scalar_lea.vmem (!%p2031_p8), [#allocation3], %s1239_s30  ;;  %p2273_p4 = scmp.ne.s32.totalorder (!%p2031_p8), %s2266_s18, 0 }
  0x65   : > { %1935 = dma.done.wait (%p2273_p4), %s184_s4, 512  }
  0x66   : > { %1937 = vsyncadd (%p2273_p4), %s184_s4, 4294966784  ;;  %p2274_p5 = scmp.eq.s32.totalorder %s2012_s16, 0 }
  0x68   : > { %1939 = dma.done.wait (%p2274_p5), [#allocation7], 10880   ;;  %p2275_p8 = pmov %p2274_p5 }
  0x69   : > { %v1967_v0 = vmov 0.0   ;;  %v237_v1 = vld [vmem:[#allocation6] sm:$0xff]  ;;  %v238_v2 = vld [vmem:[#allocation6 + $0x8] sm:$0xff]  ;;  %v239_v3 = vld [vmem:[#allocation6 + $0x10] sm:$0xff]  ;;  %vm228_vm0 = vcmask 465920   ;;  %s217_s18 = scalar_lea.vmem [#allocation9], %s1239_s30 }
  0x6a   : > { %1941 = vsyncadd (%p2275_p8), [#allocation7], 4294956416  ;;  %220 = vst [vmem:[#allocation2] sm:$0xff] %v1967_v0  ;;  %v1540_v4 = vpack.c.bf16 %v238_v2, %v237_v1  ;;  %v240_v5 = vld [vmem:[#allocation6 + $0x18] sm:$0xff]  ;;  %v241_v7 = vld [vmem:[#allocation6 + $0x20] sm:$0xff]  ;;  %s1138_s20 = sshll.u32 %s217_s18, 4  ;;  %s2210_s20 = int_to_ptr.vmem [resolvable:$true] %s1138_s20 }
  0x6b   : > { %221 = vst [vmem:[#allocation2 + $0x8] sm:$0xff] %v1967_v0  ;;  %222 = vst [vmem:[#allocation2 + $0x10] sm:$0xff] %v1967_v0  ;;  %v1544_v6 = vpack.c.bf16 %v240_v5, %v239_v3  ;;  %v242_v8 = vld [vmem:[#allocation6 + $0x28] sm:$0xff]  ;;  %v243_v10 = vld [vmem:[#allocation6 + $0x30] sm:$0xff]  ;;  %s1249_s7 = sshll.u32 %s2012_s16, 9  ;;  %s1125_s22 = scalar_lea.sflag [#allocation5], %s2172_s29 }
  0x6c   : > { %223 = vst [vmem:[#allocation2 + $0x18] sm:$0xff] %v1967_v0  ;;  %1541 = vmatprep.subr.bf16.mxu0 %v1540_v4  ;;  %v1548_v9 = vpack.c.bf16 %v242_v8, %v241_v7  ;;  %v224_v11 = vld [vmem:[%s187_s28] sm:$0xff]  ;;  %v225_v12 = vld [vmem:[%s187_s28 + $0x8] sm:$0xff]  ;;  %v244_v13 = vld [vmem:[#allocation6 + $0x38] sm:$0xff]  ;;  %s2215_s27 = scalar_lea.hbm %s2262_s3, %s1249_s7  ;;  %s1890_s16 = scalar_lea.vmem %s2210_s20, 512 }
  0x6d   : > { %1543 = vmatpush3.bf16.msra.mxu0 %v1540_v4  ;;  %229 = vst.msk [vmem:[#allocation2] sm:$0xff] %vm228_vm0, %v224_v11  ;;  %230 = vst.msk [vmem:[#allocation2 + $0x8] sm:$0xff] %vm228_vm0, %v225_v12  ;;  %v226_v14 = vld [vmem:[%s187_s28 + $0x10] sm:$0xff]  ;;  %v227_v15 = vld [vmem:[%s187_s28 + $0x18] sm:$0xff]  ;;  %v1552_v16 = vpack.c.bf16 %v244_v13, %v243_v10  ;;  %p1891_p11 = scmp.ne.s32.totalorder %s2210_s20, %s1890_s16  ;;  %p2276_p0 = scmp.ne.s32.totalorder %s2271_s6, 0 }
  0x6e   : > { %1545 = vmatprep.subr.bf16.mxu0 %v1544_v6  ;;  %231 = vst.msk [vmem:[#allocation2 + $0x10] sm:$0xff] %vm228_vm0, %v226_v14  ;;  %232 = vst.msk [vmem:[#allocation2 + $0x18] sm:$0xff] %vm228_vm0, %v227_v15  ;;  %v245_v17 = vld [vmem:[#allocation6 + $0x40] sm:$0xff]  ;;  %v246_v18 = vld [vmem:[#allocation6 + $0x48] sm:$0xff]  ;;  %s1968_s5 = smov [#allocation9]  }
  0x6f   : > { %v1556_v19 = vpack.c.bf16 %v246_v18, %v245_v17  ;;  %v247_v21 = vld [vmem:[#allocation6 + $0x50] sm:$0xff]  ;;  %v248_v22 = vld [vmem:[#allocation6 + $0x58] sm:$0xff]  ;;  %v249_v24 = vld [vmem:[#allocation6 + $0x60] sm:$0xff]  ;;  %p1892_p2 = pnand %p1891_p11, %p2276_p0  ;;  %s1894_s11 = sshll.u32 %s1968_s5, 4  ;;  %s1895_s11 = int_to_ptr.vmem [resolvable:$false] %s1894_s11 }
  0x70   : > { %v1560_v23 = vpack.c.bf16 %v248_v22, %v247_v21  ;;  %v250_v25 = vld [vmem:[#allocation6 + $0x68] sm:$0xff]  ;;  %v251_v27 = vld [vmem:[#allocation6 + $0x70] sm:$0xff]  ;;  %v252_v28 = vld [vmem:[#allocation6 + $0x78] sm:$0xff]  ;;  %s1896_s25 = scalar_lea.vmem %s1895_s11, 1024  ;;  %p1897_p7 = scmp.lt.s32.totalorder %s2210_s20, %s1895_s11 }
  0x71   : > { %1547 = vmatpush3.bf16.msra.mxu0 %v1544_v6  ;;  %v1564_v26 = vpack.c.bf16 %v250_v25, %v249_v24  ;;  %v1568_v29 = vpack.c.bf16 %v252_v28, %v251_v27  ;;  %v431_v33 = vld [vmem:[#allocation6 + $0x80] sm:$0xff]  ;;  %v432_v34 = vld [vmem:[#allocation6 + $0x88] sm:$0xff]  ;;  %v433_v36 = vld [vmem:[#allocation6 + $0x90] sm:$0xff]  ;;  %p1893_p3 = pneg %p1892_p2  ;;  %p1898_p9 = scmp.lt.s32.totalorder %s1896_s25, %s1890_s16 }
  0x72   : > { %1549 = vmatprep.subr.bf16.mxu0 %v1548_v9  ;;  %v1572_v35 = vpack.c.bf16 %v432_v34, %v431_v33  ;;  %v434_v37 = vld [vmem:[#allocation6 + $0x98] sm:$0xff]  ;;  %v435_v39 = vld [vmem:[#allocation6 + $0xa0] sm:$0xff]  ;;  %v436_v40 = vld [vmem:[#allocation6 + $0xa8] sm:$0xff] }
  0x73   : > { %v1576_v38 = vpack.c.bf16 %v434_v37, %v433_v36  ;;  %v1580_v41 = vpack.c.bf16 %v436_v40, %v435_v39  ;;  %v437_v42 = vld [vmem:[#allocation6 + $0xb0] sm:$0xff]  ;;  %v438_v43 = vld [vmem:[#allocation6 + $0xb8] sm:$0xff]  ;;  %v439_v45 = vld [vmem:[#allocation6 + $0xc0] sm:$0xff]  ;;  %v398_v40 = vlaneseq  ;;  %p1899_p12 = por %p1898_p9, %p1897_p7 }
  0x74   : > { %v233_v20 = vld [vmem:[#allocation2] sm:$0xff]  ;;  %v234_v30 = vld [vmem:[#allocation2 + $0x8] sm:$0xff]  ;;  %1573 = vmatprep.subr.bf16.mxu1 %v1572_v35  ;;  %v1584_v44 = vpack.c.bf16 %v438_v43, %v437_v42  ;;  %v441_v48 = vld [vmem:[#allocation6 + $0xd0] sm:$0xff] }
  0x75   : > { %1551 = vmatpush3.bf16.msra.mxu0 %v1548_v9  ;;  %1382 = vmatprep.mubr.f32.mxu0 %v233_v20  ;;  %v235_v31 = vld [vmem:[#allocation2 + $0x10] sm:$0xff]  ;;  %v236_v32 = vld [vmem:[#allocation2 + $0x18] sm:$0xff]  ;;  %v440_v46 = vld [vmem:[#allocation6 + $0xc8] sm:$0xff]  ;;  %v399_v42 = vshrl.u32 %v398_v40, 7  ;;  %p1900_p1 = pnand %p1899_p12, %p1893_p3 }
  0x76   : > { %1553 = vmatprep.subr.bf16.mxu0 %v1552_v16  ;;  %1575 = vmatpush3.bf16.msra.mxu1 %v1572_v35  ;;  %v1588_v47 = vpack.c.bf16 %v440_v46, %v439_v45  ;;  %v442_v49 = vld [vmem:[#allocation6 + $0xd8] sm:$0xff]  ;;  %v443_v51 = vld [vmem:[#allocation6 + $0xe0] sm:$0xff]  ;;  %v444_v52 = vld [vmem:[#allocation6 + $0xe8] sm:$0xff] }
  0x77   : > { %1577 = vmatprep.subr.bf16.mxu1 %v1576_v38  ;;  %v1592_v50 = vpack.c.bf16 %v442_v49, %v441_v48  ;;  %v1596_v53 = vpack.c.bf16 %v444_v52, %v443_v51  ;;  %v445_v54 = vld [vmem:[#allocation6 + $0xf0] sm:$0xff]  ;;  %v446_v55 = vld [vmem:[#allocation6 + $0xf8] sm:$0xff]  ;;  %v338_v43 = vld [vmem:[#allocation8] sm:$0xff] }
  0x78   : > { %v1600_v56 = vpack.c.bf16 %v446_v55, %v445_v54 }
  0x79   : > { %1555 = vmatpush3.bf16.msra.mxu0 %v1552_v16 }
  0x7a   : > { %1557 = vmatprep.subr.bf16.mxu0 %v1556_v19  ;;  %1579 = vmatpush3.bf16.msra.mxu1 %v1576_v38 }
  0x7b   : > { %1581 = vmatprep.subr.bf16.mxu1 %v1580_v41 }
  0x7d   : > { %1559 = vmatpush3.bf16.msra.mxu0 %v1556_v19 }
  0x7e   : > { %1561 = vmatprep.subr.bf16.mxu0 %v1560_v23  ;;  %1583 = vmatpush3.bf16.msra.mxu1 %v1580_v41 }
  0x7f   : > { %1585 = vmatprep.subr.bf16.mxu1 %v1584_v44 }
  0x81   : > { %1563 = vmatpush3.bf16.msra.mxu0 %v1560_v23 }
  0x82   : > { %1565 = vmatprep.subr.bf16.mxu0 %v1564_v26  ;;  %1587 = vmatpush3.bf16.msra.mxu1 %v1584_v44  ;;  %v2186_v44 = vsub.s32 0, %v399_v42 }
  0x83   : > { %1589 = vmatprep.subr.bf16.mxu1 %v1588_v47 }
  0x85   : > { %1567 = vmatpush3.bf16.msra.mxu0 %v1564_v26 }
  0x86   : > { %1569 = vmatprep.subr.bf16.mxu0 %v1568_v29  ;;  %1591 = vmatpush3.bf16.msra.mxu1 %v1588_v47 }
  0x87   : > { %1593 = vmatprep.subr.bf16.mxu1 %v1592_v50 }
  0x89   : > { %1571 = vmatpush3.bf16.msra.mxu0 %v1568_v29 }
  0x8a   : > { %1595 = vmatpush3.bf16.msra.mxu1 %v1592_v50  ;;  %v2189_v50 = vsub.s32 1, %v399_v42 }
  0x8b   : > { %1597 = vmatprep.subr.bf16.mxu1 %v1596_v53 }
  0x8c   : > { %1383 = vmatmul.mubr.f32.vlgmr.msra.gmra.mrb[0].mxu0 %v234_v30 }
  0x8d   : > { %1385 = vmatprep.mubr.f32.mxu0 %v235_v31 }
  0x8e   : > { %1599 = vmatpush3.bf16.msra.mxu1 %v1596_v53 }
  0x8f   : > { %1601 = vmatprep.subr.bf16.mxu1 %v1600_v56 }
  0x90   : > { %1386 = vmatmul.mubr.f32.gmra.mrb[2].mxu0 %v236_v32 }
  0x92   : > { %1603 = vmatpush3.bf16.msra.mxu1 %v1600_v56 }
 0x15f   : > { %v1384_v57 = vpop.f32.mrb[0].mxu0 }
 0x160   : > { %v357_v58 = vmul.f32 %v1384_v57, %v1384_v57  ;;  %v319_v59 = vpop.f32.mrb[1].mxu0 }
 0x161   : > { %v339_v60 = vadd.f32 %v1384_v57, %v319_v59  ;;  %v356_v61 = vmul.f32 %v319_v59, %v319_v59 }
 0x163   : > { %v340_v62 = vrot.slane %v339_v60, 4  ;;  %v360_v63 = vadd.f32 %v357_v58, %v356_v61  ;;  %v1387_v0 = vpop.f32.mrb[2].mxu0 }
 0x164   : > { %v359_v1 = vmul.f32 %v1387_v0, %v1387_v0  ;;  %v329_v2 = vpop.f32.mrb[3].mxu0 }
 0x165   : > { %v341_v3 = vadd.f32 %v340_v62, %v339_v60  ;;  %v361_v4 = vrot.slane %v360_v63, 4  ;;  %v346_v5 = vadd.f32 %v1387_v0, %v329_v2  ;;  %v358_v6 = vmul.f32 %v329_v2, %v329_v2 }
 0x167   : > { %v342_v7 = vrot.slane %v341_v3, 2  ;;  %v362_v8 = vadd.f32 %v361_v4, %v360_v63  ;;  %v347_v9 = vrot.slane %v346_v5, 4  ;;  %v367_v10 = vadd.f32 %v359_v1, %v358_v6 }
 0x169   : > { %v343_v11 = vadd.f32 %v342_v7, %v341_v3  ;;  %v363_v12 = vrot.slane %v362_v8, 2  ;;  %v348_v13 = vadd.f32 %v347_v9, %v346_v5  ;;  %v368_v14 = vrot.slane %v367_v10, 4 }
 0x16b   : > { %v344_v15 = vrot.slane %v343_v11, 1  ;;  %v364_v16 = vadd.f32 %v363_v12, %v362_v8  ;;  %v349_v17 = vrot.slane %v348_v13, 2  ;;  %v369_v18 = vadd.f32 %v368_v14, %v367_v10 }
 0x16d   : > { %v345_v19 = vadd.f32 %v344_v15, %v343_v11  ;;  %v365_v20 = vrot.slane %v364_v16, 1  ;;  %v350_v21 = vadd.f32 %v349_v17, %v348_v13  ;;  %v370_v22 = vrot.slane %v369_v18, 2  ;;  %v626_v13 = vld [vmem:[#allocation6 + $0x108] sm:$0xff]  ;;  %v627_v15 = vld [vmem:[#allocation6 + $0x110] sm:$0xff] }
 0x16f   : > { %v354_v23 = vmul.f32 0.0625, %v345_v19  ;;  %v366_v24 = vadd.f32 %v365_v20, %v364_v16  ;;  %v351_v25 = vrot.slane %v350_v21, 1  ;;  %v371_v26 = vadd.f32 %v370_v22, %v369_v18  ;;  %v628_v16 = vld [vmem:[#allocation6 + $0x118] sm:$0xff]  ;;  %v629_v18 = vld [vmem:[#allocation6 + $0x120] sm:$0xff]  ;;  %v630_v19 = vld [vmem:[#allocation6 + $0x128] sm:$0xff] }
 0x170   : > { %v1608_v17 = vpack.c.bf16 %v628_v16, %v627_v15  ;;  %v1612_v20 = vpack.c.bf16 %v630_v19, %v629_v18  ;;  %v632_v22 = vld [vmem:[#allocation6 + $0x138] sm:$0xff] }
 0x171   : > { %v374_v27 = vmul.f32 0.0625, %v366_v24  ;;  %v376_v28 = vmul.f32 %v354_v23, %v354_v23  ;;  %v352_v29 = vadd.f32 %v351_v25, %v350_v21  ;;  %v372_v30 = vrot.slane %v371_v26, 1  ;;  %v631_v21 = vld [vmem:[#allocation6 + $0x130] sm:$0xff]  ;;  %v633_v24 = vld [vmem:[#allocation6 + $0x140] sm:$0xff]  ;;  %v634_v25 = vld [vmem:[#allocation6 + $0x148] sm:$0xff] }
 0x173   : > { %v378_v31 = vsub.f32 %v374_v27, %v376_v28  ;;  %v355_v32 = vmul.f32 0.0625, %v352_v29  ;;  %v373_v33 = vadd.f32 %v372_v30, %v371_v26  ;;  %v1620_v26 = vpack.c.bf16 %v634_v25, %v633_v24  ;;  %v635_v27 = vld [vmem:[#allocation6 + $0x150] sm:$0xff]  ;;  %v636_v28 = vld [vmem:[#allocation6 + $0x158] sm:$0xff]  ;;  %v637_v30 = vld [vmem:[#allocation6 + $0x160] sm:$0xff] }
 0x174   : > { %v1624_v29 = vpack.c.bf16 %v636_v28, %v635_v27 }
 0x175   : > { %v380_v34 = vmax.f32 %v378_v31, 0.0  ;;  %v375_v35 = vmul.f32 0.0625, %v373_v33  ;;  %v377_v36 = vmul.f32 %v355_v32, %v355_v32  ;;  %v638_v31 = vld [vmem:[#allocation6 + $0x168] sm:$0xff]  ;;  %v639_v33 = vld [vmem:[#allocation6 + $0x170] sm:$0xff] }
 0x177   : > { %v382_v37 = vadd.f32 1e-05, %v380_v34  ;;  %v379_v38 = vsub.f32 %v375_v35, %v377_v36  ;;  %v640_v34 = vld [vmem:[#allocation6 + $0x178] sm:$0xff] }
 0x178   : > { %v1632_v35 = vpack.c.bf16 %v640_v34, %v639_v33 }
 0x179   : > { %1788 = vrsqrt.f32 %v382_v37  ;;  %v381_v39 = vmax.f32 %v379_v38, 0.0 }
 0x17b   : > { %v383_v41 = vadd.f32 1e-05, %v381_v39 }
 0x17d   : > { %1790 = vrsqrt.f32 %v383_v41 }
 0x183   : > { %v1789_v45 = vpop.eup %1788 }
 0x184   : > { %v386_v46 = vmul.f32 %v1789_v45, %v338_v43 }
 0x186   : > { %v401_v47 = vrot.slane %v386_v46, %v2186_v44  ;;  %v388_v48 = vmul.f32 %v386_v46, %v354_v23  ;;  %v1616_v23 = vpack.c.bf16 %v632_v22, %v631_v21  ;;  %v533_v22 = vld [vmem:[#allocation8 + $0x8] sm:$0xff] }
 0x187   : > { %v1791_v49 = vpop.eup %1790 }
 0x188   : > { %v406_v51 = vmul.f32 %v401_v47, %v319_v59  ;;  %v407_v52 = vmul.f32 %v1384_v57, %v401_v47  ;;  %v387_v53 = vmul.f32 %v1791_v49, %v338_v43  ;;  %v392_v54 = vrot.slane %v388_v48, 7 }
 0x18a   : > { %v389_v55 = vmul.f32 %v387_v53, %v355_v32  ;;  %v405_v56 = vrot.slane %v387_v53, %v2186_v44  ;;  %v396_v58 = vsub.f32 %v338_v43, %v392_v54  ;;  %v1628_v32 = vpack.c.bf16 %v638_v31, %v637_v30 }
 0x18c   : > { %v393_v60 = vrot.slane %v389_v55, 7  ;;  %v408_v61 = vmul.f32 %v405_v56, %v329_v2  ;;  %v409_v62 = vmul.f32 %v1387_v0, %v405_v56  ;;  %v413_v63 = vrot.slane %v396_v58, %v2189_v50  ;;  %v625_v0 = vld [vmem:[#allocation6 + $0x100] sm:$0xff] }
 0x18d   : > { %v1604_v14 = vpack.c.bf16 %v626_v13, %v625_v0 }
 0x18e   : > { %v397_v1 = vsub.f32 %v338_v43, %v393_v60  ;;  %v418_v3 = vadd.f32 %v413_v63, %v406_v51  ;;  %v419_v4 = vadd.f32 %v413_v63, %v407_v52 }
 0x18f   : > { %1605 = vmatprep.subr.bf16.mxu0 %v1604_v14 }
 0x190   : > { %v417_v5 = vrot.slane %v397_v1, %v2189_v50  ;;  %v422_v6 = vmul.f32 0.2, %v418_v3  ;;  %v423_v7 = vmul.f32 0.2, %v419_v4  ;;  %1607 = vmatpush3.bf16.msra.mxu0 %v1604_v14 }
 0x191   : > { %1609 = vmatprep.subr.bf16.mxu0 %v1608_v17 }
 0x192   : > { %v420_v59 = vadd.f32 %v417_v5, %v408_v61  ;;  %v426_v57 = vmax.f32 %v418_v3, %v422_v6  ;;  %v427_v8 = vmax.f32 %v419_v4, %v423_v7  ;;  %v421_v9 = vadd.f32 %v417_v5, %v409_v62 }
 0x194   : > { %1420 = vmatprep.mubr.f32.mxu1 %v426_v57  ;;  %v424_v10 = vmul.f32 0.2, %v420_v59  ;;  %v425_v11 = vmul.f32 0.2, %v421_v9  ;;  %1611 = vmatpush3.bf16.msra.mxu0 %v1608_v17 }
 0x195   : > { %1421 = vmatmul.mubr.f32.vlgmr.msra.gmra.mrb[0].mxu1 %v427_v8  ;;  %1613 = vmatprep.subr.bf16.mxu0 %v1612_v20 }
 0x196   : > { %v428_v12 = vmax.f32 %v420_v59, %v424_v10  ;;  %v429_v2 = vmax.f32 %v421_v9, %v425_v11 }
 0x198   : > { %1423 = vmatprep.mubr.f32.mxu1 %v428_v12  ;;  %1615 = vmatpush3.bf16.msra.mxu0 %v1612_v20 }
 0x199   : > { %1424 = vmatmul.mubr.f32.gmra.mrb[2].mxu1 %v429_v2  ;;  %1617 = vmatprep.subr.bf16.mxu0 %v1616_v23 }
 0x19c   : > { %1619 = vmatpush3.bf16.msra.mxu0 %v1616_v23 }
 0x19d   : > { %1621 = vmatprep.subr.bf16.mxu0 %v1620_v26 }
 0x1a0   : > { %1623 = vmatpush3.bf16.msra.mxu0 %v1620_v26 }
 0x1a1   : > { %1625 = vmatprep.subr.bf16.mxu0 %v1624_v29 }
 0x1a4   : > { %1627 = vmatpush3.bf16.msra.mxu0 %v1624_v29 }
 0x1a5   : > { %1629 = vmatprep.subr.bf16.mxu0 %v1628_v32 }
 0x1a8   : > { %1631 = vmatpush3.bf16.msra.mxu0 %v1628_v32 }
 0x1a9   : > { %1633 = vmatprep.subr.bf16.mxu0 %v1632_v35 }
 0x1ac   : > { %1635 = vmatpush3.bf16.msra.mxu0 %v1632_v35 }
 0x268   : > { %v1422_v36 = vpop.f32.mrb[0].mxu1 }
 0x269   : > { %v551_v37 = vmul.f32 %v1422_v36, %v1422_v36  ;;  %v513_v38 = vpop.f32.mrb[1].mxu1 }
 0x26a   : > { %v534_v39 = vadd.f32 %v1422_v36, %v513_v38  ;;  %v550_v40 = vmul.f32 %v513_v38, %v513_v38 }
 0x26c   : > { %v535_v41 = vrot.slane %v534_v39, 4  ;;  %v554_v42 = vadd.f32 %v551_v37, %v550_v40  ;;  %v1425_v43 = vpop.f32.mrb[2].mxu1 }
 0x26d   : > { %v553_v45 = vmul.f32 %v1425_v43, %v1425_v43  ;;  %v523_v46 = vpop.f32.mrb[3].mxu1 }
 0x26e   : > { %v536_v47 = vadd.f32 %v535_v41, %v534_v39  ;;  %v555_v48 = vrot.slane %v554_v42, 4  ;;  %v541_v49 = vadd.f32 %v1425_v43, %v523_v46  ;;  %v552_v51 = vmul.f32 %v523_v46, %v523_v46 }
 0x270   : > { %v537_v52 = vrot.slane %v536_v47, 2  ;;  %v556_v53 = vadd.f32 %v555_v48, %v554_v42  ;;  %v542_v54 = vrot.slane %v541_v49, 4  ;;  %v561_v55 = vadd.f32 %v553_v45, %v552_v51 }
 0x272   : > { %v538_v56 = vadd.f32 %v537_v52, %v536_v47  ;;  %v557_v58 = vrot.slane %v556_v53, 2  ;;  %v543_v60 = vadd.f32 %v542_v54, %v541_v49  ;;  %v562_v61 = vrot.slane %v561_v55, 4 }
 0x274   : > { %v539_v62 = vrot.slane %v538_v56, 1  ;;  %v558_v63 = vadd.f32 %v557_v58, %v556_v53  ;;  %v544_v1 = vrot.slane %v543_v60, 2  ;;  %v563_v3 = vadd.f32 %v562_v61, %v561_v55  ;;  %v822_v61 = vld [vmem:[#allocation6 + $0x198] sm:$0xff] }
 0x276   : > { %v540_v4 = vadd.f32 %v539_v62, %v538_v56  ;;  %v559_v5 = vrot.slane %v558_v63, 1  ;;  %v545_v6 = vadd.f32 %v544_v1, %v543_v60  ;;  %v564_v7 = vrot.slane %v563_v3, 2  ;;  %v821_v60 = vld [vmem:[#allocation6 + $0x190] sm:$0xff]  ;;  %v824_v1 = vld [vmem:[#allocation6 + $0x1a8] sm:$0xff] }
 0x277   : > { %v1640_v62 = vpack.c.bf16 %v822_v61, %v821_v60 }
 0x278   : > { %v548_v59 = vmul.f32 0.0625, %v540_v4  ;;  %v560_v57 = vadd.f32 %v559_v5, %v558_v63  ;;  %v546_v8 = vrot.slane %v545_v6, 1  ;;  %v565_v9 = vadd.f32 %v564_v7, %v563_v3  ;;  %v823_v63 = vld [vmem:[#allocation6 + $0x1a0] sm:$0xff]  ;;  %v825_v4 = vld [vmem:[#allocation6 + $0x1b0] sm:$0xff]  ;;  %v826_v5 = vld [vmem:[#allocation6 + $0x1b8] sm:$0xff] }
 0x279   : > { %v1644_v3 = vpack.c.bf16 %v824_v1, %v823_v63  ;;  %v827_v7 = vld [vmem:[#allocation6 + $0x1c0] sm:$0xff] }
 0x27a   : > { %v568_v10 = vmul.f32 0.0625, %v560_v57  ;;  %v570_v11 = vmul.f32 %v548_v59, %v548_v59  ;;  %v547_v12 = vadd.f32 %v546_v8, %v545_v6  ;;  %v566_v2 = vrot.slane %v565_v9, 1  ;;  %v829_v8 = vld [vmem:[#allocation6 + $0x1d0] sm:$0xff] }
 0x27b   : > { %v1648_v6 = vpack.c.bf16 %v826_v5, %v825_v4  ;;  %v727_v5 = vld [vmem:[#allocation8 + $0x10] sm:$0xff] }
 0x27c   : > { %v572_v0 = vsub.f32 %v568_v10, %v570_v11  ;;  %v549_v13 = vmul.f32 0.0625, %v547_v12  ;;  %v567_v14 = vadd.f32 %v566_v2, %v565_v9  ;;  %v830_v9 = vld [vmem:[#allocation6 + $0x1d8] sm:$0xff]  ;;  %v831_v11 = vld [vmem:[#allocation6 + $0x1e0] sm:$0xff]  ;;  %v832_v12 = vld [vmem:[#allocation6 + $0x1e8] sm:$0xff] }
 0x27d   : > { %v1656_v10 = vpack.c.bf16 %v830_v9, %v829_v8  ;;  %v1660_v2 = vpack.c.bf16 %v832_v12, %v831_v11 }
 0x27e   : > { %v574_v15 = vmax.f32 %v572_v0, 0.0  ;;  %v569_v16 = vmul.f32 0.0625, %v567_v14  ;;  %v571_v17 = vmul.f32 %v549_v13, %v549_v13  ;;  %v833_v0 = vld [vmem:[#allocation6 + $0x1f0] sm:$0xff] }
 0x280   : > { %v576_v18 = vadd.f32 1e-05, %v574_v15  ;;  %v573_v19 = vsub.f32 %v569_v16, %v571_v17 }
 0x282   : > { %1792 = vrsqrt.f32 %v576_v18  ;;  %v575_v20 = vmax.f32 %v573_v19, 0.0 }
 0x284   : > { %v577_v21 = vadd.f32 1e-05, %v575_v20 }
 0x286   : > { %1794 = vrsqrt.f32 %v577_v21 }
 0x28c   : > { %v1793_v23 = vpop.eup %1792 }
 0x28d   : > { %v580_v24 = vmul.f32 %v1793_v23, %v533_v22 }
 0x28f   : > { %v582_v25 = vmul.f32 %v580_v24, %v548_v59  ;;  %v595_v26 = vrot.slane %v580_v24, %v2186_v44  ;;  %v828_v59 = vld [vmem:[#allocation6 + $0x1c8] sm:$0xff] }
 0x290   : > { %v1795_v27 = vpop.eup %1794  ;;  %v1652_v57 = vpack.c.bf16 %v828_v59, %v827_v7 }
 0x291   : > { %v586_v28 = vrot.slane %v582_v25, 7  ;;  %v600_v29 = vmul.f32 %v595_v26, %v513_v38  ;;  %v601_v30 = vmul.f32 %v1422_v36, %v595_v26  ;;  %v581_v31 = vmul.f32 %v1795_v27, %v533_v22 }
 0x293   : > { %v590_v32 = vsub.f32 %v533_v22, %v586_v28  ;;  %v583_v33 = vmul.f32 %v581_v31, %v549_v13  ;;  %v599_v34 = vrot.slane %v581_v31, %v2186_v44  ;;  %v834_v13 = vld [vmem:[#allocation6 + $0x1f8] sm:$0xff] }
 0x294   : > { %v1664_v14 = vpack.c.bf16 %v834_v13, %v833_v0 }
 0x295   : > { %v607_v35 = vrot.slane %v590_v32, %v2189_v50  ;;  %v587_v37 = vrot.slane %v583_v33, 7  ;;  %v602_v39 = vmul.f32 %v599_v34, %v523_v46  ;;  %v603_v40 = vmul.f32 %v1425_v43, %v599_v34  ;;  %v819_v43 = vld [vmem:[#allocation6 + $0x180] sm:$0xff]  ;;  %v820_v46 = vld [vmem:[#allocation6 + $0x188] sm:$0xff] }
 0x296   : > { %v1636_v58 = vpack.c.bf16 %v820_v46, %v819_v43 }
 0x297   : > { %v612_v41 = vadd.f32 %v607_v35, %v600_v29  ;;  %v613_v42 = vadd.f32 %v607_v35, %v601_v30  ;;  %v591_v45 = vsub.f32 %v533_v22, %v587_v37 }
 0x298   : > { %1637 = vmatprep.subr.bf16.mxu1 %v1636_v58 }
 0x299   : > { %v617_v47 = vmul.f32 0.2, %v613_v42  ;;  %v611_v48 = vrot.slane %v591_v45, %v2189_v50  ;;  %v616_v49 = vmul.f32 0.2, %v612_v41  ;;  %1639 = vmatpush3.bf16.msra.mxu1 %v1636_v58 }
 0x29a   : > { %1641 = vmatprep.subr.bf16.mxu1 %v1640_v62 }
 0x29b   : > { %v621_v51 = vmax.f32 %v613_v42, %v617_v47  ;;  %v614_v38 = vadd.f32 %v611_v48, %v602_v39  ;;  %v620_v36 = vmax.f32 %v612_v41, %v616_v49  ;;  %v615_v52 = vadd.f32 %v611_v48, %v603_v40 }
 0x29d   : > { %1458 = vmatprep.mubr.f32.mxu0 %v620_v36  ;;  %v618_v53 = vmul.f32 0.2, %v614_v38  ;;  %v619_v54 = vmul.f32 0.2, %v615_v52  ;;  %1643 = vmatpush3.bf16.msra.mxu1 %v1640_v62 }
 0x29e   : > { %1459 = vmatmul.mubr.f32.vlgmr.msra.gmra.mrb[4].mxu0 %v621_v51  ;;  %1645 = vmatprep.subr.bf16.mxu1 %v1644_v3 }
 0x29f   : > { %v622_v55 = vmax.f32 %v614_v38, %v618_v53  ;;  %v623_v56 = vmax.f32 %v615_v52, %v619_v54 }
 0x2a1   : > { %1461 = vmatprep.mubr.f32.mxu0 %v622_v55  ;;  %1647 = vmatpush3.bf16.msra.mxu1 %v1644_v3 }
 0x2a2   : > { %1462 = vmatmul.mubr.f32.gmra.mrb[6].mxu0 %v623_v56  ;;  %1649 = vmatprep.subr.bf16.mxu1 %v1648_v6 }
 0x2a5   : > { %1651 = vmatpush3.bf16.msra.mxu1 %v1648_v6 }
 0x2a6   : > { %1653 = vmatprep.subr.bf16.mxu1 %v1652_v57 }
 0x2a9   : > { %1655 = vmatpush3.bf16.msra.mxu1 %v1652_v57 }
 0x2aa   : > { %1657 = vmatprep.subr.bf16.mxu1 %v1656_v10 }
 0x2ad   : > { %1659 = vmatpush3.bf16.msra.mxu1 %v1656_v10 }
 0x2ae   : > { %1661 = vmatprep.subr.bf16.mxu1 %v1660_v2 }
 0x2b1   : > { %1663 = vmatpush3.bf16.msra.mxu1 %v1660_v2 }
 0x2b2   : > { %1665 = vmatprep.subr.bf16.mxu1 %v1664_v14 }
 0x2b5   : > { %1667 = vmatpush3.bf16.msra.mxu1 %v1664_v14 }
 0x371   : > { %v1460_v15 = vpop.f32.mrb[4].mxu0 }
 0x372   : > { %v745_v16 = vmul.f32 %v1460_v15, %v1460_v15  ;;  %v707_v17 = vpop.f32.mrb[5].mxu0 }
 0x373   : > { %v728_v18 = vadd.f32 %v1460_v15, %v707_v17  ;;  %v744_v19 = vmul.f32 %v707_v17, %v707_v17 }
 0x375   : > { %v729_v20 = vrot.slane %v728_v18, 4  ;;  %v748_v21 = vadd.f32 %v745_v16, %v744_v19  ;;  %v1463_v22 = vpop.f32.mrb[6].mxu0 }
 0x376   : > { %v747_v23 = vmul.f32 %v1463_v22, %v1463_v22  ;;  %v717_v24 = vpop.f32.mrb[7].mxu0 }
 0x377   : > { %v730_v25 = vadd.f32 %v729_v20, %v728_v18  ;;  %v749_v26 = vrot.slane %v748_v21, 4  ;;  %v735_v27 = vadd.f32 %v1463_v22, %v717_v24  ;;  %v746_v28 = vmul.f32 %v717_v24, %v717_v24 }
 0x379   : > { %v731_v29 = vrot.slane %v730_v25, 2  ;;  %v750_v30 = vadd.f32 %v749_v26, %v748_v21  ;;  %v736_v31 = vrot.slane %v735_v27, 4  ;;  %v755_v32 = vadd.f32 %v747_v23, %v746_v28 }
 0x37b   : > { %v732_v33 = vadd.f32 %v731_v29, %v730_v25  ;;  %v751_v34 = vrot.slane %v750_v30, 2  ;;  %v737_v35 = vadd.f32 %v736_v31, %v735_v27  ;;  %v756_v37 = vrot.slane %v755_v32, 4 }
 0x37d   : > { %v733_v39 = vrot.slane %v732_v33, 1  ;;  %v752_v40 = vadd.f32 %v751_v34, %v750_v30  ;;  %v738_v41 = vrot.slane %v737_v35, 2  ;;  %v757_v42 = vadd.f32 %v756_v37, %v755_v32  ;;  %v1018_v37 = vld [vmem:[#allocation6 + $0x218] sm:$0xff] }
 0x37f   : > { %v734_v45 = vadd.f32 %v733_v39, %v732_v33  ;;  %v753_v47 = vrot.slane %v752_v40, 1  ;;  %v739_v48 = vadd.f32 %v738_v41, %v737_v35  ;;  %v758_v49 = vrot.slane %v757_v42, 2  ;;  %v1017_v35 = vld [vmem:[#allocation6 + $0x210] sm:$0xff]  ;;  %v1020_v41 = vld [vmem:[#allocation6 + $0x228] sm:$0xff] }
 0x380   : > { %v1672_v39 = vpack.c.bf16 %v1018_v37, %v1017_v35 }
 0x381   : > { %v742_v51 = vmul.f32 0.0625, %v734_v45  ;;  %v754_v38 = vadd.f32 %v753_v47, %v752_v40  ;;  %v740_v36 = vrot.slane %v739_v48, 1  ;;  %v759_v52 = vadd.f32 %v758_v49, %v757_v42  ;;  %v1019_v40 = vld [vmem:[#allocation6 + $0x220] sm:$0xff]  ;;  %v1021_v45 = vld [vmem:[#allocation6 + $0x230] sm:$0xff]  ;;  %v1022_v47 = vld [vmem:[#allocation6 + $0x238] sm:$0xff] }
 0x382   : > { %v1676_v42 = vpack.c.bf16 %v1020_v41, %v1019_v40  ;;  %v1023_v49 = vld [vmem:[#allocation6 + $0x240] sm:$0xff] }
 0x383   : > { %v762_v53 = vmul.f32 0.0625, %v754_v38  ;;  %v764_v54 = vmul.f32 %v742_v51, %v742_v51  ;;  %v741_v55 = vadd.f32 %v740_v36, %v739_v48  ;;  %v760_v56 = vrot.slane %v759_v52, 1  ;;  %v1025_v36 = vld [vmem:[#allocation6 + $0x250] sm:$0xff] }
 0x384   : > { %v1680_v48 = vpack.c.bf16 %v1022_v47, %v1021_v45  ;;  %v921_v47 = vld [vmem:[#allocation8 + $0x18] sm:$0xff] }
 0x385   : > { %v766_v43 = vsub.f32 %v762_v53, %v764_v54  ;;  %v743_v46 = vmul.f32 0.0625, %v741_v55  ;;  %v761_v58 = vadd.f32 %v760_v56, %v759_v52  ;;  %v1026_v52 = vld [vmem:[#allocation6 + $0x258] sm:$0xff]  ;;  %v1027_v54 = vld [vmem:[#allocation6 + $0x260] sm:$0xff]  ;;  %v1028_v55 = vld [vmem:[#allocation6 + $0x268] sm:$0xff] }
 0x386   : > { %v1688_v53 = vpack.c.bf16 %v1026_v52, %v1025_v36  ;;  %v1692_v56 = vpack.c.bf16 %v1028_v55, %v1027_v54 }
 0x387   : > { %v768_v60 = vmax.f32 %v766_v43, 0.0  ;;  %v763_v61 = vmul.f32 0.0625, %v761_v58  ;;  %v765_v62 = vmul.f32 %v743_v46, %v743_v46  ;;  %v1029_v43 = vld [vmem:[#allocation6 + $0x270] sm:$0xff] }
 0x389   : > { %v770_v63 = vadd.f32 1e-05, %v768_v60  ;;  %v767_v1 = vsub.f32 %v763_v61, %v765_v62 }
 0x38b   : > { %1796 = vrsqrt.f32 %v770_v63  ;;  %v769_v3 = vmax.f32 %v767_v1, 0.0 }
 0x38d   : > { %v771_v4 = vadd.f32 1e-05, %v769_v3 }
 0x38f   : > { %1798 = vrsqrt.f32 %v771_v4 }
 0x395   : > { %v1797_v6 = vpop.eup %1796 }
 0x396   : > { %v774_v7 = vmul.f32 %v1797_v6, %v727_v5 }
 0x398   : > { %v776_v59 = vmul.f32 %v774_v7, %v742_v51  ;;  %v789_v57 = vrot.slane %v774_v7, %v2186_v44  ;;  %v1024_v51 = vld [vmem:[#allocation6 + $0x248] sm:$0xff] }
 0x399   : > { %v1799_v8 = vpop.eup %1798  ;;  %v1684_v38 = vpack.c.bf16 %v1024_v51, %v1023_v49 }
 0x39a   : > { %v780_v9 = vrot.slane %v776_v59, 7  ;;  %v794_v10 = vmul.f32 %v789_v57, %v707_v17  ;;  %v795_v11 = vmul.f32 %v1460_v15, %v789_v57  ;;  %v775_v12 = vmul.f32 %v1799_v8, %v727_v5 }
 0x39c   : > { %v784_v2 = vsub.f32 %v727_v5, %v780_v9  ;;  %v777_v0 = vmul.f32 %v775_v12, %v743_v46  ;;  %v793_v13 = vrot.slane %v775_v12, %v2186_v44  ;;  %v1030_v46 = vld [vmem:[#allocation6 + $0x278] sm:$0xff] }
 0x39d   : > { %v1696_v58 = vpack.c.bf16 %v1030_v46, %v1029_v43 }
 0x39e   : > { %v801_v14 = vrot.slane %v784_v2, %v2189_v50  ;;  %v781_v16 = vrot.slane %v777_v0, 7  ;;  %v796_v18 = vmul.f32 %v793_v13, %v717_v24  ;;  %v797_v19 = vmul.f32 %v1463_v22, %v793_v13  ;;  %v1015_v22 = vld [vmem:[#allocation6 + $0x200] sm:$0xff]  ;;  %v1016_v24 = vld [vmem:[#allocation6 + $0x208] sm:$0xff] }
 0x39f   : > { %v1668_v34 = vpack.c.bf16 %v1016_v24, %v1015_v22 }
 0x3a0   : > { %v806_v20 = vadd.f32 %v801_v14, %v794_v10  ;;  %v807_v21 = vadd.f32 %v801_v14, %v795_v11  ;;  %v785_v23 = vsub.f32 %v727_v5, %v781_v16 }
 0x3a1   : > { %1669 = vmatprep.subr.bf16.mxu0 %v1668_v34  ;;  %1700 = vmatprep.subr.bf16.mxu1 %v1668_v34 }
 0x3a2   : > { %v811_v25 = vmul.f32 0.2, %v807_v21  ;;  %v805_v26 = vrot.slane %v785_v23, %v2189_v50  ;;  %v810_v27 = vmul.f32 0.2, %v806_v20  ;;  %1671 = vmatpush3.bf16.msra.mxu0 %v1668_v34 }
 0x3a3   : > { %1673 = vmatprep.subr.bf16.mxu0 %v1672_v39 }
 0x3a4   : > { %v815_v28 = vmax.f32 %v807_v21, %v811_v25  ;;  %v808_v17 = vadd.f32 %v805_v26, %v796_v18  ;;  %v814_v15 = vmax.f32 %v806_v20, %v810_v27  ;;  %v809_v29 = vadd.f32 %v805_v26, %v797_v19 }
 0x3a6   : > { %1496 = vmatprep.mubr.f32.mxu1 %v814_v15  ;;  %v812_v30 = vmul.f32 0.2, %v808_v17  ;;  %v813_v31 = vmul.f32 0.2, %v809_v29  ;;  %1675 = vmatpush3.bf16.msra.mxu0 %v1672_v39 }
 0x3a7   : > { %1497 = vmatmul.mubr.f32.vlgmr.msra.gmra.mrb[4].mxu1 %v815_v28  ;;  %1677 = vmatprep.subr.bf16.mxu0 %v1676_v42 }
 0x3a8   : > { %v816_v32 = vmax.f32 %v808_v17, %v812_v30  ;;  %v817_v33 = vmax.f32 %v809_v29, %v813_v31  ;;  %1708 = vmatpush3.bf16.msra.mxu1 %v1668_v34 }
 0x3a9   : > { %1701 = vmatprep.subr.bf16.mxu1 %v1672_v39 }
 0x3aa   : > { %1499 = vmatprep.mubr.f32.mxu1 %v816_v32  ;;  %1679 = vmatpush3.bf16.msra.mxu0 %v1676_v42 }
 0x3ab   : > { %1500 = vmatmul.mubr.f32.gmra.mrb[6].mxu1 %v817_v33  ;;  %1681 = vmatprep.subr.bf16.mxu0 %v1680_v48 }
 0x3ac   : > { %1709 = vmatpush3.bf16.msra.mxu1 %v1672_v39 }
 0x3ad   : > { %1702 = vmatprep.subr.bf16.mxu1 %v1676_v42 }
 0x3ae   : > { %1683 = vmatpush3.bf16.msra.mxu0 %v1680_v48 }
 0x3af   : > { %1685 = vmatprep.subr.bf16.mxu0 %v1684_v38 }
 0x3b0   : > { %1710 = vmatpush3.bf16.msra.mxu1 %v1676_v42 }
 0x3b1   : > { %1703 = vmatprep.subr.bf16.mxu1 %v1680_v48 }
 0x3b2   : > { %1687 = vmatpush3.bf16.msra.mxu0 %v1684_v38 }
 0x3b3   : > { %1689 = vmatprep.subr.bf16.mxu0 %v1688_v53 }
 0x3b4   : > { %1711 = vmatpush3.bf16.msra.mxu1 %v1680_v48 }
 0x3b5   : > { %1704 = vmatprep.subr.bf16.mxu1 %v1684_v38 }
 0x3b6   : > { %1691 = vmatpush3.bf16.msra.mxu0 %v1688_v53 }
 0x3b7   : > { %1693 = vmatprep.subr.bf16.mxu0 %v1692_v56 }
 0x3b8   : > { %1712 = vmatpush3.bf16.msra.mxu1 %v1684_v38 }
 0x3b9   : > { %1705 = vmatprep.subr.bf16.mxu1 %v1688_v53 }
 0x3ba   : > { %1695 = vmatpush3.bf16.msra.mxu0 %v1692_v56 }
 0x3bb   : > { %1697 = vmatprep.subr.bf16.mxu0 %v1696_v58 }
 0x3bc   : > { %1713 = vmatpush3.bf16.msra.mxu1 %v1688_v53 }
 0x3bd   : > { %1706 = vmatprep.subr.bf16.mxu1 %v1692_v56 }
 0x3be   : > { %1699 = vmatpush3.bf16.msra.mxu0 %v1696_v58 }
 0x3c0   : > { %1714 = vmatpush3.bf16.msra.mxu1 %v1692_v56 }
 0x3c1   : > { %1707 = vmatprep.subr.bf16.mxu1 %v1696_v58 }
 0x3c4   : > { %1715 = vmatpush3.bf16.msra.mxu1 %v1696_v58 }
 0x47a   : > { %v1498_v60 = vpop.f32.mrb[4].mxu1 }
 0x47b   : > { %v939_v61 = vmul.f32 %v1498_v60, %v1498_v60  ;;  %v901_v62 = vpop.f32.mrb[5].mxu1 }
 0x47c   : > { %v922_v63 = vadd.f32 %v1498_v60, %v901_v62  ;;  %v938_v1 = vmul.f32 %v901_v62, %v901_v62 }
 0x47e   : > { %v923_v3 = vrot.slane %v922_v63, 4  ;;  %v942_v4 = vadd.f32 %v939_v61, %v938_v1  ;;  %v1501_v5 = vpop.f32.mrb[6].mxu1 }
 0x47f   : > { %v941_v6 = vmul.f32 %v1501_v5, %v1501_v5  ;;  %v911_v7 = vpop.f32.mrb[7].mxu1 }
 0x480   : > { %v924_v59 = vadd.f32 %v923_v3, %v922_v63  ;;  %v943_v57 = vrot.slane %v942_v4, 4  ;;  %v929_v8 = vadd.f32 %v1501_v5, %v911_v7  ;;  %v940_v9 = vmul.f32 %v911_v7, %v911_v7 }
 0x482   : > { %v925_v10 = vrot.slane %v924_v59, 2  ;;  %v944_v11 = vadd.f32 %v943_v57, %v942_v4  ;;  %v930_v12 = vrot.slane %v929_v8, 4  ;;  %v949_v2 = vadd.f32 %v941_v6, %v940_v9 }
 0x484   : > { %v926_v0 = vadd.f32 %v925_v10, %v924_v59  ;;  %v945_v13 = vrot.slane %v944_v11, 2  ;;  %v931_v14 = vadd.f32 %v930_v12, %v929_v8  ;;  %v950_v16 = vrot.slane %v949_v2, 4 }
 0x486   : > { %v927_v18 = vrot.slane %v926_v0, 1  ;;  %v946_v19 = vadd.f32 %v945_v13, %v944_v11  ;;  %v932_v20 = vrot.slane %v931_v14, 2  ;;  %v951_v21 = vadd.f32 %v950_v16, %v949_v2 }
 0x488   : > { %v928_v23 = vadd.f32 %v927_v18, %v926_v0  ;;  %v947_v25 = vrot.slane %v946_v19, 1  ;;  %v933_v26 = vadd.f32 %v932_v20, %v931_v14  ;;  %v952_v27 = vrot.slane %v951_v21, 2 }
 0x48a   : > { %v936_v28 = vmul.f32 0.0625, %v928_v23  ;;  %v948_v17 = vadd.f32 %v947_v25, %v946_v19  ;;  %v934_v15 = vrot.slane %v933_v26, 1  ;;  %v953_v29 = vadd.f32 %v952_v27, %v951_v21 }
 0x48c   : > { %v956_v30 = vmul.f32 0.0625, %v948_v17  ;;  %v958_v31 = vmul.f32 %v936_v28, %v936_v28  ;;  %v935_v32 = vadd.f32 %v934_v15, %v933_v26  ;;  %v954_v33 = vrot.slane %v953_v29, 1 }
 0x48e   : > { %v960_v22 = vsub.f32 %v956_v30, %v958_v31  ;;  %v937_v24 = vmul.f32 0.0625, %v935_v32  ;;  %v955_v34 = vadd.f32 %v954_v33, %v953_v29 }
 0x490   : > { %v962_v35 = vmax.f32 %v960_v22, 0.0  ;;  %v957_v37 = vmul.f32 0.0625, %v955_v34  ;;  %v959_v39 = vmul.f32 %v937_v24, %v937_v24 }
 0x492   : > { %v964_v40 = vadd.f32 1e-05, %v962_v35  ;;  %v961_v41 = vsub.f32 %v957_v37, %v959_v39 }
 0x494   : > { %1800 = vrsqrt.f32 %v964_v40  ;;  %v963_v42 = vmax.f32 %v961_v41, 0.0 }
 0x496   : > { %v965_v45 = vadd.f32 1e-05, %v963_v42 }
 0x498   : > { %1802 = vrsqrt.f32 %v965_v45 }
 0x49e   : > { %v1801_v48 = vpop.eup %1800 }
 0x49f   : > { %v968_v49 = vmul.f32 %v1801_v48, %v921_v47 }
 0x4a1   : > { %v970_v51 = vmul.f32 %v968_v49, %v936_v28  ;;  %v983_v38 = vrot.slane %v968_v49, %v2186_v44 }
 0x4a2   : > { %v1803_v36 = vpop.eup %1802 }
 0x4a3   : > { %v974_v52 = vrot.slane %v970_v51, 7  ;;  %v988_v53 = vmul.f32 %v983_v38, %v901_v62  ;;  %v989_v54 = vmul.f32 %v1498_v60, %v983_v38  ;;  %v969_v55 = vmul.f32 %v1803_v36, %v921_v47 }
 0x4a5   : > { %v978_v56 = vsub.f32 %v921_v47, %v974_v52  ;;  %v971_v43 = vmul.f32 %v969_v55, %v937_v24  ;;  %v987_v46 = vrot.slane %v969_v55, %v2186_v44 }
 0x4a7   : > { %v995_v58 = vrot.slane %v978_v56, %v2189_v50  ;;  %v975_v61 = vrot.slane %v971_v43, 7  ;;  %v990_v63 = vmul.f32 %v987_v46, %v911_v7  ;;  %v991_v1 = vmul.f32 %v1501_v5, %v987_v46  ;;  %v1013_v5 = vld [vmem:[#allocation8 + $0x20] sm:$0xff] }
 0x4a8   : > { %v1034_v0 = vrot.slane %v1013_v5, %v2186_v44 }
 0x4a9   : > { %v1000_v3 = vadd.f32 %v995_v58, %v988_v53  ;;  %v1001_v4 = vadd.f32 %v995_v58, %v989_v54  ;;  %v979_v6 = vsub.f32 %v921_v47, %v975_v61 }
 0x4ab   : > { %v1005_v59 = vmul.f32 0.2, %v1001_v4  ;;  %v999_v57 = vrot.slane %v979_v6, %v2189_v50  ;;  %v1004_v8 = vmul.f32 0.2, %v1000_v3 }
 0x4ad   : > { %v1009_v9 = vmax.f32 %v1001_v4, %v1005_v59  ;;  %v1002_v60 = vadd.f32 %v999_v57, %v990_v63  ;;  %v1003_v62 = vadd.f32 %v999_v57, %v991_v1  ;;  %v1008_v10 = vmax.f32 %v1000_v3, %v1004_v8 }
 0x4af   : > { %v1007_v11 = vmul.f32 0.2, %v1003_v62  ;;  %1534 = vmatprep.mubr.f32.mxu0 %v1008_v10  ;;  %v1006_v12 = vmul.f32 0.2, %v1002_v60 }
 0x4b0   : > { %1535 = vmatmul.mubr.f32.vlgmr.msra.gmra.mrb[8].mxu0 %v1009_v9 }
 0x4b1   : > { %v1011_v2 = vmax.f32 %v1003_v62, %v1007_v11  ;;  %v1010_v7 = vmax.f32 %v1002_v60, %v1006_v12 }
 0x4b3   : > { %1537 = vmatprep.mubr.f32.mxu1 %v1010_v7 }
 0x4b4   : > { %1538 = vmatmul.mubr.f32.vlgmr.msra.gmra.mrb[8].mxu1 %v1011_v2 }
 0x583   : > { %v1536_v13 = vpop.f32.mrb[8].mxu0 }
 0x584   : > { %v1107_v50 = vadd.f32 %v1536_v13, %v1034_v0  ;;  %v1101_v14 = vpop.f32.mrb[9].mxu0 }
 0x585   : > { %v1102_v16 = vadd.f32 %v1101_v14, %v1034_v0 }
 0x586   : > { %1121 = vst [vmem:[%s217_s18 + $0x8] sm:$0xff] %v1107_v50 }
 0x587   : > { %1120 = vst [vmem:[%s217_s18] sm:$0xff] %v1102_v16  ;;  %v1539_v18 = vpop.f32.mrb[8].mxu1 }
 0x588   : > { %v1117_v19 = vadd.f32 %v1539_v18, %v1034_v0  ;;  %v1111_v44 = vpop.f32.mrb[9].mxu1 }
 0x589   : > { %v1112_v20 = vadd.f32 %v1111_v44, %v1034_v0 }
 0x58a   : > { %1123 = vst [vmem:[%s217_s18 + $0x18] sm:$0xff] %v1117_v19 }
 0x58b   : > { %1122 = vst [vmem:[%s217_s18 + $0x10] sm:$0xff] %v1112_v20 }
 0x58c   : > { %1903 = shalt.err (!%p1900_p1)
}
 0x58d   : > { %s1904_s10 = scalar_lea.hbm %s2215_s27, 512  ;;  %s1908_s26 = scalar_lea.hbm %s2262_s3, 1024 }
 0x58e   : > { %p1905_p13 = scmp.ne.s32.totalorder %s2215_s27, %s1904_s10  ;;  %p1909_p4 = scmp.lt.u32.totalorder %s2215_s27, %s2262_s3 }
 0x58f   : > { %p1910_p5 = scmp.lt.u32.totalorder %s1908_s26, %s1904_s10  ;;  %p1912_p11 = scmp.lt.u32.totalorder %s1904_s10, %s2215_s27 }
 0x590   : > { %p1906_p6 = pnand %p1905_p13, %p2276_p0 }
 0x591   : > { %p1911_p8 = por %p1910_p5, %p1909_p4 }
 0x592   : > { %p1907_p10 = pneg %p1906_p6 }
 0x593   : > { %p1913_p2 = por %p1912_p11, %p1911_p8 }
 0x595   : > { %p1914_p3 = pnand %p1913_p2, %p1907_p10 }
 0x597   : > { %1917 = shalt.err (!%p1914_p3)
}
 0x598   : > { %s1969_s28 = smov 128   ;;  %s1970_s18 = smov 8  }
 0x599   : > { %1726 = dma.vmem_to_hbm [thread:$0]  (%p2276_p0), %s2210_s20, 512, %s2215_s27, %s1125_s22, %s1969_s28, %s1969_s28, %s1970_s18  }
 0x59a PF: > { %s1153_s7 = sand.u32 1, %s1948_s12   ;;  %p2277_p7 = scmp.ne.s32.totalorder %s2267_s19, 0 }
 0x59b   : > { %p2278_p9 = scmp.ge.s32.totalorder %s1960_s15, 2  ;;  %s1154_s8 = scalar_lea.sflag [#allocation5], %s1153_s7 }
 0x59d   : > { %p1740_p12 = pnand %p2278_p9, %p2277_p7 }
 0x59f   : > { %1943 = dma.done.wait (!%p1740_p12), %s1154_s8, 512  }
 0x5a0   : > { %1945 = vsyncadd (!%p1740_p12), %s1154_s8, 4294966784  ;;  %p17_p1 = scmp.ge.s32.totalorder %s2107_s23, 4   ;;  %s2279_s12 = smov %s1952_s13 }
 0x5a1   : > { %s2280_s13 = smov %s1956_s14  ;;  %s2281_s14 = smov %s2123_s9 }
 0x5a2   : > { %s2282_s15 = smov %s2107_s23  ;;  %19 = sbr.rel (!%p17_p1) target bundleno = 6 (0x6), region = 93 }
 0x5a9   :  { %1159 = vsyncpa [#allocation4], 1 }
 0x5aa   :  { %1161 = vsyncpa [#allocation4 + $0x1], 1 }
 0x5ab   :  { %1162 = vsyncpa [#allocation7], 1 }
 0x5ac   :  { %1163 = vsyncpa [#allocation5], 1 }
 0x5ad   :  { %1165 = vsyncpa [#allocation5 + $0x1], 1 }

</bundles_post_ra>
